<compile_context>
chip_gen: v5e
topology: v5e:2x2
jax: 0.10.0
libtpu: 0.0.40
codegen_flags: <defaults>
</compile_context>

<pallas_src>
import jax
import jax.numpy as jnp
from jax.experimental import pallas as pl
from jax.experimental.pallas import tpu as pltpu


def _matmul_mish_tanh_kernel(p_ref, w_ref, o_ref):
    # p_ref: (Kpad, Mpad) bf16 -- im2col patches (+ ones row for bias) for one batch
    # w_ref: (Cout, Kpad) bf16 -- conv weight (+ bias column), matmul LHS
    # o_ref: (Cout, Mpad) f32
    z = jnp.dot(w_ref[...], p_ref[...], preferred_element_type=jnp.float32)
    # Mish(z) = z * tanh(softplus(z)); tanh(softplus(z)) = (e^2+2e)/(e^2+2e+2)
    # with e = exp(z).  Clamp z before exp so e^2 cannot overflow f32 (for
    # z >= 20 the ratio rounds to exactly 1.0 in f32, so the clamp is lossless).
    e = jnp.exp(jnp.minimum(z, 20.0))
    num = e * e + 2.0 * e
    ratio = num * pl.reciprocal(num + 2.0, approx=True)
    o_ref[...] = jnp.tanh(z * ratio).astype(o_ref.dtype)


def _round_up(x, m):
    return ((x + m - 1) // m) * m


def conv3d_mish_tanh(x_ncdhw, weight_oidhw, bias, *, stride=1, padding=0):
    """PyTorch-compatible wrapper: x (N,Cin,D,H,W), weight (Cout,Cin,KD,KH,KW)."""
    assert stride == 1 and padding == 0, "kernel implements stride=1, padding=0"
    N, Cin, D, H, W = x_ncdhw.shape
    Cout, Cin_w, KD, KH, KW = weight_oidhw.shape
    assert Cin == Cin_w
    Do, Ho, Wo = D - KD + 1, H - KH + 1, W - KW + 1
    M = Do * Ho * Wo
    K = Cin * KD * KH * KW
    Kpad = _round_up(K + 1, 32)      # +1 row of ones carries the folded bias
    Mpad = _round_up(M, 128)

    # ---- wrapper-side layout plumbing (pure data movement, no compute) ----
    # Cast to bf16 FIRST so all im2col intermediates are half the size; with
    # allow_input_fusion below, XLA is allowed to fuse this producer chain
    # into the pallas_call input feed instead of a separate HBM round trip.
    # TODO(synk): building the patch slab fully in-kernel (raw NCDHW input +
    # 27 static slice copies into VMEM scratch) would remove the 27x expansion
    # entirely, but the (14,14,14)->2744 lane relayouts it needs are not
    # cleanly supported by Mosaic today.
    x_b = x_ncdhw.astype(jnp.bfloat16)
    taps = []
    for kd in range(KD):
        for kh in range(KH):
            for kw in range(KW):
                taps.append(x_b[:, :, kd:kd + Do, kh:kh + Ho, kw:kw + Wo])
    patches = jnp.stack(taps, axis=2)                    # (N, Cin, T, Do, Ho, Wo)
    patches = patches.reshape(N, K, M)                   # K idx = cin*T + tap (matches weight)
    ones_row = jnp.ones((N, 1, M), jnp.bfloat16)         # folded-bias row
    zeros_k = jnp.zeros((N, Kpad - K - 1, M), jnp.bfloat16)
    patches = jnp.concatenate([patches, ones_row, zeros_k], axis=1)  # (N, Kpad, M)
    patches = jnp.pad(patches, ((0, 0), (0, 0), (0, Mpad - M)))      # (N, Kpad, Mpad)

    w2 = weight_oidhw.reshape(Cout, K).astype(jnp.float32)
    w2 = jnp.concatenate([w2, bias.reshape(Cout, 1).astype(jnp.float32)], axis=1)
    w2 = jnp.pad(w2, ((0, 0), (0, Kpad - K - 1))).astype(jnp.bfloat16)  # (Cout, Kpad)

    out = pl.pallas_call(
        _matmul_mish_tanh_kernel,
        out_shape=jax.ShapeDtypeStruct((N, Cout, Mpad), jnp.float32),
        grid=(N,),
        in_specs=[
            # One batch element's patch slab per grid step (double-buffered).
            pl.BlockSpec((pl.Squeezed(), Kpad, Mpad), lambda n: (n, 0, 0)),
            # Tiny weight block, same block every step.
            pl.BlockSpec((Cout, Kpad), lambda n: (0, 0)),
        ],
        out_specs=pl.BlockSpec((pl.Squeezed(), Cout, Mpad), lambda n: (n, 0, 0)),
        compiler_params=pltpu.CompilerParams(
            dimension_semantics=("parallel",),
            allow_input_fusion=[True, True]),
    )(patches, w2)

    # Slice off M padding; (N, Cout, M) -> NCDHW is a free reshape.
    return out[:, :, :M].reshape(N, Cout, Do, Ho, Wo)


if __name__ == "__main__":
    key = jax.random.PRNGKey(0)
    k_x, k_w, k_b = jax.random.split(key, 3)

    # Shapes implied by the module: in_channels=3, out_channels=16, K=3.
    N, Cin, D, H, W = 2, 3, 16, 16, 16
    Cout, Kk = 16, 3

    x = jax.random.normal(k_x, (N, Cin, D, H, W), jnp.float32)
    fan_in = Cin * Kk * Kk * Kk
    bound = 1.0 / (fan_in ** 0.5)
    # Deterministic, PyTorch-Conv3d-like uniform init (synthetic, no checkpoint).
    conv_weight = jax.random.uniform(k_w, (Cout, Cin, Kk, Kk, Kk), jnp.float32,
                                     minval=-bound, maxval=bound)
    conv_bias = jax.random.uniform(k_b, (Cout,), jnp.float32,
                                   minval=-bound, maxval=bound)

    out = conv3d_mish_tanh(x, conv_weight, conv_bias, stride=1, padding=0)
    out = jax.block_until_ready(out)

    # Sanity check against an XLA reference of the same math (f32).
    ref_conv = jax.lax.conv_general_dilated(
        x, conv_weight, window_strides=(1, 1, 1), padding="VALID",
        dimension_numbers=("NCDHW", "OIDHW", "NCDHW"))
    ref_conv = ref_conv + conv_bias.reshape(1, Cout, 1, 1, 1)
    sp = jnp.maximum(ref_conv, 0.0) + jnp.log1p(jnp.exp(-jnp.abs(ref_conv)))
    ref = jnp.tanh(ref_conv * jnp.tanh(sp))

    assert out.shape == (N, Cout, D - Kk + 1, H - Kk + 1, W - Kk + 1)
    assert jnp.allclose(out, ref, atol=1e-2, rtol=1e-2)
    print("KERNEL_OK")
</pallas_src>

<mosaic_0001>
module attributes {stable_mosaic.version = 11 : i64} {
  func.func @_matmul_mish_tanh_kernel(%arg0: i32, %arg1: memref<1x96x2816xbf16, #tpu.memory_space<vmem>>, %arg2: memref<16x96xbf16, #tpu.memory_space<vmem>>, %arg3: memref<1x16x2816xf32, #tpu.memory_space<vmem>>) attributes {dimension_semantics = [#tpu.dimension_semantics<parallel>], iteration_bounds = array<i64: 2>, scalar_prefetch = 0 : i64, scratch_operands = 0 : i64, tpu.core_type = #tpu.core_type<tc>, window_params = [{transform_indices = @transform_0, window_bounds = array<i64: 1, 96, 2816>}, {pipeline_mode = #tpu.pipeline_mode<synchronous>, transform_indices = @transform_1, window_bounds = array<i64: 16, 96>}, {transform_indices = @transform_2, window_bounds = array<i64: 1, 16, 2816>}]} {
    %c0 = arith.constant 0 : index
    %c0_0 = arith.constant 0 : index
    %0 = vector.load %arg2[%c0, %c0_0] : memref<16x96xbf16, #tpu.memory_space<vmem>>, vector<16x96xbf16>
    %c0_1 = arith.constant 0 : index
    %c0_2 = arith.constant 0 : index
    %c0_3 = arith.constant 0 : index
    %1 = vector.load %arg1[%c0_1, %c0_2, %c0_3] : memref<1x96x2816xbf16, #tpu.memory_space<vmem>>, vector<1x96x2816xbf16>
    %2 = vector.shape_cast %1 : vector<1x96x2816xbf16> to vector<96x2816xbf16>
    %cst = arith.constant dense<0.000000e+00> : vector<16x2816xf32>
    %3 = tpu.matmul %0, %2, %cst {dimension_numbers = #tpu.dot_dimension_numbers<[1], [0], [0], [1], [0, 0, 1, 1], [], []>} : vector<16x96xbf16>, vector<96x2816xbf16>, vector<16x2816xf32> -> vector<16x2816xf32>
    %cst_4 = arith.constant 2.000000e+01 : f32
    %4 = vector.broadcast %cst_4 : f32 to vector<16x2816xf32>
    %5 = arith.minimumf %3, %4 : vector<16x2816xf32>
    %6 = math.exp %5 : vector<16x2816xf32>
    %7 = arith.mulf %6, %6 : vector<16x2816xf32>
    %cst_5 = arith.constant 2.000000e+00 : f32
    %8 = vector.broadcast %cst_5 : f32 to vector<16x2816xf32>
    %9 = arith.mulf %8, %6 : vector<16x2816xf32>
    %10 = arith.addf %7, %9 : vector<16x2816xf32>
    %cst_6 = arith.constant 2.000000e+00 : f32
    %11 = vector.broadcast %cst_6 : f32 to vector<16x2816xf32>
    %12 = arith.addf %10, %11 : vector<16x2816xf32>
    %13 = tpu.reciprocal %12 {approx = true} : vector<16x2816xf32> -> vector<16x2816xf32>
    %14 = arith.mulf %10, %13 : vector<16x2816xf32>
    %15 = arith.mulf %3, %14 : vector<16x2816xf32>
    %16 = math.tanh %15 : vector<16x2816xf32>
    %c0_7 = arith.constant 0 : index
    %c0_8 = arith.constant 0 : index
    %c0_9 = arith.constant 0 : index
    %17 = vector.load %arg3[%c0_7, %c0_8, %c0_9] : memref<1x16x2816xf32, #tpu.memory_space<vmem>>, vector<1x16x2816xf32>
    %18 = vector.shape_cast %17 : vector<1x16x2816xf32> to vector<16x2816xf32>
    %19 = vector.shape_cast %16 : vector<16x2816xf32> to vector<1x16x2816xf32>
    tpu.vector_store %arg3[%c0_7, %c0_8, %c0_9], %19 {strides = array<i32>} : memref<1x16x2816xf32, #tpu.memory_space<vmem>>, vector<1x16x2816xf32>,
    return
  }
  func.func @transform_0(%arg0: i32) -> (i32, i32, i32) {
    %c0_i32 = arith.constant 0 : i32
    %c0_i32_0 = arith.constant 0 : i32
    %c0_i32_1 = arith.constant 0 : i32
    return %arg0, %c0_i32, %c0_i32_0 : i32, i32, i32
  }
  func.func @transform_1(%arg0: i32) -> (i32, i32) {
    %c0_i32 = arith.constant 0 : i32
    %c0_i32_0 = arith.constant 0 : i32
    %c0_i32_1 = arith.constant 0 : i32
    return %c0_i32, %c0_i32_0 : i32, i32
  }
  func.func @transform_2(%arg0: i32) -> (i32, i32, i32) {
    %c0_i32 = arith.constant 0 : i32
    %c0_i32_0 = arith.constant 0 : i32
    %c0_i32_1 = arith.constant 0 : i32
    return %arg0, %c0_i32, %c0_i32_0 : i32, i32, i32
  }
}

</mosaic_0001>

<bundles_post_ra>
// kernel: tpu_custom_call.1
= control target key start
LH: loop header
LB: loop body
LE: loop exit
PB: predicated region body
PF: predicated region fallthrough
CT: control target
= control target key end

     0   :  { %7 = vsyncpa [#allocation3], 0  ;;  %s3811_s0 = inlined_call_operand.hbm [shape: bf16[2,96,2816], index: 0, kind: input, shape index: {}]   ;;  %s3812_s1 = inlined_call_operand.hbm [shape: bf16[16,96], index: 1, kind: input, shape index: {}]   ;;  %s3813_s2 = inlined_call_operand.hbm [shape: f32[2,16,2816], index: 2, kind: output, shape index: {}]  }
   0x1   :  { %9 = vsyncpa [#allocation3 + $0x1], 0 }
   0x2   :  { %10 = vsyncpa [#allocation6], 0 }
   0x3   :  { %11 = vsyncpa [#allocation4], 0 }
   0x4   :  { %13 = vsyncpa [#allocation4 + $0x1], 0  ;;  %s3103_s9 = smov 0   ;;  %s3105_s10 = smov 0  }
   0x5   :  { %s3107_s11 = smov 0   ;;  %s3109_s12 = smov 0  }
   0x6 LB: > { %s3124_s13 = sadd.s32 4294967295, %s3079_s12   ;;  %s1920_s14 = sadd.s32 4294967294, %s3079_s12   ;;  %s3079_s12 = sphi %s3109_s12, %s3823_s12   ;;  %s3075_s11 = sphi %s3107_s11, %s3822_s11   ;;  %s3071_s10 = sphi %s3105_s10, %s3821_s10   ;;  %s3067_s9 = sphi %s3103_s9, %s3820_s9  }
   0x7   : > { %p39_p0 = scmp.ne.s32.totalorder %s3071_s10, %s3067_s9  ;;  %p40_p1 = scmp.eq.s32.totalorder %s3124_s13, 0 }
   0x8   : > { %p84_p2 = scmp.eq.s32.totalorder %s3124_s13, 1  ;;  %p90_p3 = scmp.eq.s32.totalorder %s1920_s14, 1 }
   0x9   : > { %p3133_p4 = por %p40_p1, %p39_p0  ;;  %p1921_p5 = scmp.ge.s32.totalorder %s3079_s12, 1 }
   0xa   : > { %p3138_p6 = por %p90_p3, %p39_p0  ;;  %p97_p7 = scmp.lt.s32.totalorder %s3079_s12, 3 }
   0xb   : > { %s108_s19 = sshll.u32 %s3812_s1, 4  ;;  %s3081_s21 = smov [#allocation5]   ;;  %s109_s19 = int_to_ptr.hbm [resolvable:$true] %s108_s19 }
   0xc   : > { %p3146_p8 = pnand %p1921_p5, %p97_p7  ;;  %s110_s22 = sshll.u32 %s3081_s21, 4  ;;  %s111_s22 = int_to_ptr.vmem [resolvable:$true] %s110_s22 }
   0xd   : > { %s3156_s23 = sadd.s32 1, %s3079_s12   ;;  %s3082_s24 = smov 64  }
   0xe   : > { %p2630_p9 = pneg %p3146_p8  ;;  %s3083_s25 = smov 4  }
   0xf   : > { %s23_s26 = ssub.s32 %s3079_s12, %s3156_s23  ;;  %s26_s27 = sadd.s32 1, %s3075_s11 }
  0x10   : > { %p2631_p10 = pnand %p2630_p9, %p40_p1  ;;  %p24_p12 = scmp.eq.s32.totalorder %s23_s26, 0 }
  0x11   : > { %p33_p13 = scmp.ne.s32.totalorder %s3075_s11, %s3071_s10  ;;  %p34_p0 = scmp.eq.s32.totalorder %s3079_s12, 0 }
  0x12   : > { %2633 = dma.hbm_to_vmem [thread:$0]  (!%p2631_p10), %s109_s19, 128, %s111_s22, [#allocation6], %s3082_s24, %s3082_s24, %s3083_s25  }
  0x13   : > { %p2643_p3 = scmp.lt.s32.totalorder %s3079_s12, 2  ;;  %p35_p5 = por %p34_p0, %p33_p13 }
  0x14   : > { %s3166_s28 = scalar_select %p24_p12, %s3075_s11, %s26_s27  }
  0x15   : > { %p3170_p7 = por %p84_p2, %p33_p13  ;;  %s124_s30 = sand.u32 1, %s3075_s11  }
  0x16   : > { %s2618_s3 = smul.u32 1056, %s3079_s12  ;;  %p3179_p9 = pnand %p2643_p3, %p35_p5 }
  0x17   : > { %s2617_s4 = smul.u32 1056, %s124_s30  ;;  %s125_s19 = scalar_lea.sflag [#allocation3], %s124_s30 }
  0x18   : > { %s133_s7 = scalar_lea.hbm %s3811_s0, %s2618_s3  ;;  %p2983_p10 = pneg %p3179_p9 }
  0x19   : > { %s134_s14 = sshll.u32 %s133_s7, 4  ;;  %s128_s17 = scalar_lea.vmem [#allocation2], %s2617_s4  ;;  %s135_s14 = int_to_ptr.hbm [resolvable:$true] %s134_s14 }
  0x1a   : > { %s136_s18 = sshll.u32 %s128_s17, 4  ;;  %s2979_s21 = sshra.s32 %s135_s14, 4  ;;  %s137_s18 = int_to_ptr.vmem [resolvable:$true] %s136_s18  ;;  %s2980_s21 = int_to_ptr.hbm [resolvable:$true] %s2979_s21 }
  0x1b   : > { %s2981_s22 = scalar_lea.hbm %s2980_s21, 1056  ;;  %s2986_s26 = scalar_lea.hbm %s3811_s0, 2112 }
  0x1c   : > { %p2982_p2 = scmp.ne.s32.totalorder %s2980_s21, %s2981_s22  ;;  %p2987_p0 = scmp.lt.s32.totalorder %s2980_s21, %s3811_s0 }
  0x1d   : > { %p2988_p3 = scmp.lt.s32.totalorder %s2986_s26, %s2981_s22 }
  0x1e   : > { %p2984_p12 = pnand %p2983_p10, %p2982_p2 }
  0x1f   : > { %p2989_p5 = por %p2988_p3, %p2987_p0 }
  0x20   : > { %p2985_p13 = pneg %p2984_p12 }
  0x22   : > { %p2990_p11 = pnand %p2989_p5, %p2985_p13 }
  0x24   : > { %2993 = shalt.err (!%p2990_p11)
}
  0x25   : > { %s3084_s30 = smov 1408   ;;  %s3085_s4 = smov 88  }
  0x26   : > { %2637 = dma.hbm_to_vmem [thread:$0]  (!%p3179_p9), %s135_s14, 16896, %s137_s18, %s125_s19, %s3084_s30, %s3084_s30, %s3085_s4  }
  0x27   : > { %148 = sbr.rel (%p3146_p8) target bundleno = 379 (0x17b), region = 28  ;;  %s3196_s5 = sand.u32 (!%p3146_p8), 1, %s3071_s10  }
  0x28   : > { %s2619_s6 = smul.u32 (!%p3146_p8), 1056, %s3196_s5  ;;  %s151_s7 = scalar_lea.sflag (!%p3146_p8), [#allocation3], %s3196_s5 }
  0x2a   : > { %s3200_s17 = scalar_lea.vmem (!%p3146_p8), [#allocation2], %s2619_s6 }
  0x2c   : > { %3054 = dma.done.wait (%p3133_p4), %s151_s7, 16896  }
  0x2d   : > { %3056 = vsyncadd (%p3133_p4), %s151_s7, 4294950400 }
  0x2e   : > { %3058 = dma.done.wait (%p40_p1), [#allocation6], 128  }
  0x2f   : > { %3060 = vsyncadd (%p40_p1), [#allocation6], 4294967168  ;;  %v2373_v0 = vld [vmem:[%s3200_s17 + $0x370] sm:$0xf]  ;;  %v2606_v1 = vld [vmem:[%s3200_s17 + $0x3c4] sm:$0xf0] }
  0x30   : > { %v2595_v2 = vld [vmem:[%s3200_s17 + $0x374] sm:$0xf]  ;;  %v2374_v3 = vor.u32 %v2606_v1, %v2373_v0  ;;  %v2375_v4 = vld [vmem:[%s3200_s17 + $0x3c8] sm:$0xf0]  ;;  %v2381_v5 = vld [vmem:[%s3200_s17 + $0x378] sm:$0xf] }
  0x31   : > { %v2607_v6 = vld [vmem:[%s3200_s17 + $0x3cc] sm:$0xf0]  ;;  %v2378_v7 = vor.u32 %v2595_v2, %v2375_v4  ;;  %v2596_v9 = vld [vmem:[%s3200_s17 + $0x37c] sm:$0xf]  ;;  %v2383_v10 = vld [vmem:[%s3200_s17 + $0x3d0] sm:$0xf0] }
  0x32   : > { %v2382_v8 = vor.u32 %v2607_v6, %v2381_v5  ;;  %v2285_v11 = vld [vmem:[%s3200_s17 + $0x2c0] sm:$0xf]  ;;  %987 = vmatpush.bf16.msra.mxu0 %v2374_v3  ;;  %v2386_v12 = vor.u32 %v2596_v9, %v2383_v10  ;;  %v2584_v13 = vld [vmem:[%s3200_s17 + $0x314] sm:$0xf0]  ;;  %v2573_v14 = vld [vmem:[%s3200_s17 + $0x2c4] sm:$0xf] }
  0x33   : > { %v2287_v15 = vld [vmem:[%s3200_s17 + $0x318] sm:$0xf0]  ;;  %1001 = vmatpush.bf16.msra.mxu1 %v2378_v7  ;;  %v2286_v16 = vor.u32 %v2584_v13, %v2285_v11  ;;  %v2293_v18 = vld [vmem:[%s3200_s17 + $0x2c8] sm:$0xf]  ;;  %v2585_v19 = vld [vmem:[%s3200_s17 + $0x31c] sm:$0xf0] }
  0x34   : > { %1015 = vmatpush.bf16.msra.mxu2 %v2382_v8  ;;  %v2290_v17 = vor.u32 %v2573_v14, %v2287_v15  ;;  %v2574_v20 = vld [vmem:[%s3200_s17 + $0x2cc] sm:$0xf]  ;;  %1029 = vmatpush.bf16.msra.mxu3 %v2386_v12  ;;  %v2294_v21 = vor.u32 %v2585_v19, %v2293_v18  ;;  %v2295_v22 = vld [vmem:[%s3200_s17 + $0x320] sm:$0xf0]  ;;  %v2197_v23 = vld [vmem:[%s3200_s17 + $0x210] sm:$0xf] }
  0x35   : > { %v2562_v24 = vld [vmem:[%s3200_s17 + $0x264] sm:$0xf0]  ;;  %v2298_v25 = vor.u32 %v2574_v20, %v2295_v22  ;;  %v2551_v26 = vld [vmem:[%s3200_s17 + $0x214] sm:$0xf]  ;;  %v2199_v27 = vld [vmem:[%s3200_s17 + $0x268] sm:$0xf0] }
  0x36   : > { %v2205_v28 = vld [vmem:[%s3200_s17 + $0x218] sm:$0xf]  ;;  %988 = vmatpush.bf16.msra.mxu0 %v2286_v16  ;;  %v2198_v29 = vor.u32 %v2562_v24, %v2197_v23  ;;  %v2563_v30 = vld [vmem:[%s3200_s17 + $0x26c] sm:$0xf0]  ;;  %v2552_v31 = vld [vmem:[%s3200_s17 + $0x21c] sm:$0xf]  ;;  %v2202_v33 = vor.u32 %v2551_v26, %v2199_v27 }
  0x37   : > { %v2207_v32 = vld [vmem:[%s3200_s17 + $0x270] sm:$0xf0]  ;;  %1002 = vmatpush.bf16.msra.mxu1 %v2290_v17  ;;  %v2206_v34 = vor.u32 %v2563_v30, %v2205_v28  ;;  %v2109_v35 = vld [vmem:[%s3200_s17 + $0x160] sm:$0xf]  ;;  %v2540_v36 = vld [vmem:[%s3200_s17 + $0x1b4] sm:$0xf0] }
  0x38   : > { %1016 = vmatpush.bf16.msra.mxu2 %v2294_v21  ;;  %v2529_v37 = vld [vmem:[%s3200_s17 + $0x164] sm:$0xf]  ;;  %1030 = vmatpush.bf16.msra.mxu3 %v2298_v25  ;;  %v2210_v38 = vor.u32 %v2552_v31, %v2207_v32  ;;  %v2111_v39 = vld [vmem:[%s3200_s17 + $0x1b8] sm:$0xf0]  ;;  %v2117_v40 = vld [vmem:[%s3200_s17 + $0x168] sm:$0xf]  ;;  %v2110_v44 = vor.u32 %v2540_v36, %v2109_v35 }
  0x39   : > { %v2541_v41 = vld [vmem:[%s3200_s17 + $0x1bc] sm:$0xf0]  ;;  %v2530_v42 = vld [vmem:[%s3200_s17 + $0x16c] sm:$0xf]  ;;  %v2119_v43 = vld [vmem:[%s3200_s17 + $0x1c0] sm:$0xf0]  ;;  %v2114_v45 = vor.u32 %v2529_v37, %v2111_v39 }
  0x3a   : > { %989 = vmatpush.bf16.msra.mxu0 %v2198_v29  ;;  %v2118_v46 = vor.u32 %v2541_v41, %v2117_v40  ;;  %v2021_v47 = vld [vmem:[%s3200_s17 + $0xb0] sm:$0xf]  ;;  %v2518_v48 = vld [vmem:[%s3200_s17 + $0x104] sm:$0xf0]  ;;  %v2507_v49 = vld [vmem:[%s3200_s17 + $0xb4] sm:$0xf]  ;;  %v2122_v50 = vor.u32 %v2530_v42, %v2119_v43 }
  0x3b   : > { %1003 = vmatpush.bf16.msra.mxu1 %v2202_v33  ;;  %v2023_v51 = vld [vmem:[%s3200_s17 + $0x108] sm:$0xf0]  ;;  %v2029_v52 = vld [vmem:[%s3200_s17 + $0xb8] sm:$0xf]  ;;  %v2519_v53 = vld [vmem:[%s3200_s17 + $0x10c] sm:$0xf0]  ;;  %v2022_v56 = vor.u32 %v2518_v48, %v2021_v47 }
  0x3c   : > { %1017 = vmatpush.bf16.msra.mxu2 %v2206_v34  ;;  %1031 = vmatpush.bf16.msra.mxu3 %v2210_v38  ;;  %v2508_v54 = vld [vmem:[%s3200_s17 + $0xbc] sm:$0xf]  ;;  %v2031_v55 = vld [vmem:[%s3200_s17 + $0x110] sm:$0xf0]  ;;  %v1933_v57 = vld [vmem:[%s3200_s17] sm:$0xf]  ;;  %v2026_v59 = vor.u32 %v2507_v49, %v2023_v51  ;;  %v2030_v60 = vor.u32 %v2519_v53, %v2029_v52 }
  0x3d   : > { %v2496_v58 = vld [vmem:[%s3200_s17 + $0x54] sm:$0xf0]  ;;  %v2485_v61 = vld [vmem:[%s3200_s17 + $0x4] sm:$0xf]  ;;  %v1935_v62 = vld [vmem:[%s3200_s17 + $0x58] sm:$0xf0]  ;;  %v2034_v0 = vor.u32 %v2508_v54, %v2031_v55 }
  0x3e   : > { %990 = vmatpush.bf16.msra.mxu0 %v2110_v44  ;;  %v1941_v63 = vld [vmem:[%s3200_s17 + $0x8] sm:$0xf]  ;;  %v2497_v1 = vld [vmem:[%s3200_s17 + $0x5c] sm:$0xf0]  ;;  %v2486_v2 = vld [vmem:[%s3200_s17 + $0xc] sm:$0xf]  ;;  %v1934_v7 = vor.u32 %v2496_v58, %v1933_v57  ;;  %v1938_v11 = vor.u32 %v2485_v61, %v1935_v62 }
  0x3f   : > { %1004 = vmatpush.bf16.msra.mxu1 %v2114_v45  ;;  %v1943_v3 = vld [vmem:[%s3200_s17 + $0x60] sm:$0xf0]  ;;  %v2389_v4 = vld [vmem:[%s3200_s17 + $0x380] sm:$0xf]  ;;  %v2608_v5 = vld [vmem:[%s3200_s17 + $0x3d4] sm:$0xf0]  ;;  %v1942_v12 = vor.u32 %v2497_v1, %v1941_v63 }
  0x40   : > { %1018 = vmatpush.bf16.msra.mxu2 %v2118_v46  ;;  %1032 = vmatpush.bf16.msra.mxu3 %v2122_v50  ;;  %v2597_v6 = vld [vmem:[%s3200_s17 + $0x384] sm:$0xf]  ;;  %v2391_v8 = vld [vmem:[%s3200_s17 + $0x3d8] sm:$0xf0]  ;;  %v2397_v9 = vld [vmem:[%s3200_s17 + $0x388] sm:$0xf]  ;;  %v1946_v15 = vor.u32 %v2486_v2, %v1943_v3  ;;  %v2390_v16 = vor.u32 %v2608_v5, %v2389_v4 }
  0x41   : > { %v2609_v10 = vld [vmem:[%s3200_s17 + $0x3dc] sm:$0xf0]  ;;  %v2598_v13 = vld [vmem:[%s3200_s17 + $0x38c] sm:$0xf]  ;;  %v2399_v14 = vld [vmem:[%s3200_s17 + $0x3e0] sm:$0xf0]  ;;  %v2394_v18 = vor.u32 %v2597_v6, %v2391_v8 }
  0x42   : > { %991 = vmatpush.bf16.msra.mxu0 %v2022_v56  ;;  %v3266_v17 = vld [vmem:[#allocation5] sm:$0xff]  ;;  %v2398_v19 = vor.u32 %v2609_v10, %v2397_v9  ;;  %v2301_v20 = vld [vmem:[%s3200_s17 + $0x2d0] sm:$0xf]  ;;  %v2586_v21 = vld [vmem:[%s3200_s17 + $0x324] sm:$0xf0]  ;;  %v2402_v23 = vor.u32 %v2598_v13, %v2399_v14  ;;  %vm981_vm0 = vcmask 785408  }
  0x43   : > { %1005 = vmatpush.bf16.msra.mxu1 %v2026_v59  ;;  %v2575_v22 = vld [vmem:[%s3200_s17 + $0x2d4] sm:$0xf]  ;;  %v2303_v24 = vld [vmem:[%s3200_s17 + $0x328] sm:$0xf0]  ;;  %v2309_v25 = vld [vmem:[%s3200_s17 + $0x2d8] sm:$0xf]  ;;  %v2302_v29 = vor.u32 %v2586_v21, %v2301_v20 }
  0x44   : > { %1019 = vmatpush.bf16.msra.mxu2 %v2030_v60  ;;  %1033 = vmatpush.bf16.msra.mxu3 %v2034_v0  ;;  %v2587_v26 = vld [vmem:[%s3200_s17 + $0x32c] sm:$0xf0]  ;;  %v2576_v27 = vld [vmem:[%s3200_s17 + $0x2dc] sm:$0xf]  ;;  %v2311_v28 = vld [vmem:[%s3200_s17 + $0x330] sm:$0xf0]  ;;  %v2306_v30 = vor.u32 %v2575_v22, %v2303_v24 }
  0x45   : > { %v2310_v31 = vor.u32 %v2587_v26, %v2309_v25  ;;  %v2213_v32 = vld [vmem:[%s3200_s17 + $0x220] sm:$0xf]  ;;  %v2564_v33 = vld [vmem:[%s3200_s17 + $0x274] sm:$0xf0]  ;;  %v2553_v34 = vld [vmem:[%s3200_s17 + $0x224] sm:$0xf]  ;;  %v2314_v35 = vor.u32 %v2576_v27, %v2311_v28 }
  0x46   : > { %992 = vmatpush.bf16.msra.mxu0 %v1934_v7  ;;  %v2215_v36 = vld [vmem:[%s3200_s17 + $0x278] sm:$0xf0]  ;;  %v2221_v37 = vld [vmem:[%s3200_s17 + $0x228] sm:$0xf]  ;;  %v2565_v38 = vld [vmem:[%s3200_s17 + $0x27c] sm:$0xf0]  ;;  %v2214_v41 = vor.u32 %v2564_v33, %v2213_v32 }
  0x47   : > { %1006 = vmatpush.bf16.msra.mxu1 %v1938_v11  ;;  %v2554_v39 = vld [vmem:[%s3200_s17 + $0x22c] sm:$0xf]  ;;  %v2223_v40 = vld [vmem:[%s3200_s17 + $0x280] sm:$0xf0]  ;;  %v2218_v42 = vor.u32 %v2553_v34, %v2215_v36  ;;  %v2222_v43 = vor.u32 %v2565_v38, %v2221_v37  ;;  %v2125_v44 = vld [vmem:[%s3200_s17 + $0x170] sm:$0xf] }
  0x48   : > { %1020 = vmatpush.bf16.msra.mxu2 %v1942_v12  ;;  %1034 = vmatpush.bf16.msra.mxu3 %v1946_v15  ;;  %v2542_v45 = vld [vmem:[%s3200_s17 + $0x1c4] sm:$0xf0]  ;;  %v2531_v46 = vld [vmem:[%s3200_s17 + $0x174] sm:$0xf]  ;;  %v2226_v47 = vor.u32 %v2554_v39, %v2223_v40  ;;  %v2127_v48 = vld [vmem:[%s3200_s17 + $0x1c8] sm:$0xf0] }
  0x49   : > { %2459 = vmatmul.msk.bf16.vlgmr.msra.gmra.mxu0 %vm981_vm0, %v3266_v17  ;;  %v2133_v49 = vld [vmem:[%s3200_s17 + $0x178] sm:$0xf]  ;;  %v2543_v50 = vld [vmem:[%s3200_s17 + $0x1cc] sm:$0xf0]  ;;  %v2532_v51 = vld [vmem:[%s3200_s17 + $0x17c] sm:$0xf]  ;;  %v2126_v53 = vor.u32 %v2542_v45, %v2125_v44  ;;  %v2130_v54 = vor.u32 %v2531_v46, %v2127_v48 }
  0x4a   : > { %1043 = vmatpush.bf16.msrb.mxu0 %v2390_v16  ;;  %2460 = vmatmul.msk.bf16.vlgmr.msra.gmra.mxu1 %vm981_vm0, %v3266_v17  ;;  %v2135_v52 = vld [vmem:[%s3200_s17 + $0x1d0] sm:$0xf0]  ;;  %v2134_v55 = vor.u32 %v2543_v50, %v2133_v49  ;;  %v2037_v56 = vld [vmem:[%s3200_s17 + $0xc0] sm:$0xf]  ;;  %v2520_v57 = vld [vmem:[%s3200_s17 + $0x114] sm:$0xf0] }
  0x4b   : > { %1057 = vmatpush.bf16.msrb.mxu1 %v2394_v18  ;;  %2461 = vmatmul.msk.bf16.vlgmr.msra.gmra.mxu2 %vm981_vm0, %v3266_v17  ;;  %v2509_v58 = vld [vmem:[%s3200_s17 + $0xc4] sm:$0xf]  ;;  %v2138_v59 = vor.u32 %v2532_v51, %v2135_v52  ;;  %v2039_v60 = vld [vmem:[%s3200_s17 + $0x118] sm:$0xf0]  ;;  %v2045_v61 = vld [vmem:[%s3200_s17 + $0xc8] sm:$0xf]  ;;  %v2038_v1 = vor.u32 %v2520_v57, %v2037_v56 }
  0x4c   : > { %1071 = vmatpush.bf16.msrb.mxu2 %v2398_v19  ;;  %1085 = vmatpush.bf16.msrb.mxu3 %v2402_v23  ;;  %v2521_v62 = vld [vmem:[%s3200_s17 + $0x11c] sm:$0xf0]  ;;  %v2510_v63 = vld [vmem:[%s3200_s17 + $0xcc] sm:$0xf]  ;;  %v2047_v0 = vld [vmem:[%s3200_s17 + $0x120] sm:$0xf0]  ;;  %v2042_v4 = vor.u32 %v2509_v58, %v2039_v60 }
  0x4d   : > { %2462 = vmatmul.msk.bf16.vlgmr.msra.gmra.mxu3 %vm981_vm0, %v3266_v17  ;;  %v1949_v2 = vld [vmem:[%s3200_s17 + $0x10] sm:$0xf]  ;;  %v2498_v3 = vld [vmem:[%s3200_s17 + $0x64] sm:$0xf0]  ;;  %v2046_v5 = vor.u32 %v2521_v62, %v2045_v61  ;;  %v2487_v6 = vld [vmem:[%s3200_s17 + $0x14] sm:$0xf]  ;;  %v2050_v9 = vor.u32 %v2510_v63, %v2047_v0 }
  0x4e   : > { %1044 = vmatpush.bf16.msrb.mxu0 %v2302_v29  ;;  %v1951_v7 = vld [vmem:[%s3200_s17 + $0x68] sm:$0xf0]  ;;  %v1957_v8 = vld [vmem:[%s3200_s17 + $0x18] sm:$0xf]  ;;  %v2499_v10 = vld [vmem:[%s3200_s17 + $0x6c] sm:$0xf0]  ;;  %v1950_v16 = vor.u32 %v2498_v3, %v1949_v2 }
  0x4f   : > { %1058 = vmatpush.bf16.msrb.mxu1 %v2306_v30  ;;  %v2488_v11 = vld [vmem:[%s3200_s17 + $0x1c] sm:$0xf]  ;;  %v1959_v12 = vld [vmem:[%s3200_s17 + $0x70] sm:$0xf0]  ;;  %v2405_v13 = vld [vmem:[%s3200_s17 + $0x390] sm:$0xf]  ;;  %v1954_v21 = vor.u32 %v2487_v6, %v1951_v7  ;;  %v1958_v22 = vor.u32 %v2499_v10, %v1957_v8 }
  0x50   : > { %1072 = vmatpush.bf16.msrb.mxu2 %v2310_v31  ;;  %1086 = vmatpush.bf16.msrb.mxu3 %v2314_v35  ;;  %v2610_v14 = vld [vmem:[%s3200_s17 + $0x3e4] sm:$0xf0]  ;;  %v2599_v15 = vld [vmem:[%s3200_s17 + $0x394] sm:$0xf]  ;;  %v2407_v18 = vld [vmem:[%s3200_s17 + $0x3e8] sm:$0xf0]  ;;  %v1962_v25 = vor.u32 %v2488_v11, %v1959_v12 }
  0x51   : > { %v2413_v19 = vld [vmem:[%s3200_s17 + $0x398] sm:$0xf]  ;;  %v2611_v20 = vld [vmem:[%s3200_s17 + $0x3ec] sm:$0xf0]  ;;  %v2600_v23 = vld [vmem:[%s3200_s17 + $0x39c] sm:$0xf]  ;;  %v2406_v26 = vor.u32 %v2610_v14, %v2405_v13  ;;  %v2410_v27 = vor.u32 %v2599_v15, %v2407_v18 }
  0x52   : > { %1045 = vmatpush.bf16.msrb.mxu0 %v2214_v41  ;;  %v2415_v24 = vld [vmem:[%s3200_s17 + $0x3f0] sm:$0xf0]  ;;  %v2414_v28 = vor.u32 %v2611_v20, %v2413_v19  ;;  %v2317_v29 = vld [vmem:[%s3200_s17 + $0x2e0] sm:$0xf]  ;;  %v2588_v30 = vld [vmem:[%s3200_s17 + $0x334] sm:$0xf0] }
  0x53   : > { %1059 = vmatpush.bf16.msrb.mxu1 %v2218_v42  ;;  %v2577_v31 = vld [vmem:[%s3200_s17 + $0x2e4] sm:$0xf]  ;;  %v2418_v32 = vor.u32 %v2600_v23, %v2415_v24  ;;  %v2319_v33 = vld [vmem:[%s3200_s17 + $0x338] sm:$0xf0]  ;;  %v2325_v34 = vld [vmem:[%s3200_s17 + $0x2e8] sm:$0xf]  ;;  %v2318_v38 = vor.u32 %v2588_v30, %v2317_v29 }
  0x54   : > { %1073 = vmatpush.bf16.msrb.mxu2 %v2222_v43  ;;  %1087 = vmatpush.bf16.msrb.mxu3 %v2226_v47  ;;  %v2589_v35 = vld [vmem:[%s3200_s17 + $0x33c] sm:$0xf0]  ;;  %v2578_v36 = vld [vmem:[%s3200_s17 + $0x2ec] sm:$0xf]  ;;  %v2327_v37 = vld [vmem:[%s3200_s17 + $0x340] sm:$0xf0]  ;;  %v2322_v39 = vor.u32 %v2577_v31, %v2319_v33 }
  0x55   : > { %v2326_v40 = vor.u32 %v2589_v35, %v2325_v34  ;;  %v2229_v41 = vld [vmem:[%s3200_s17 + $0x230] sm:$0xf]  ;;  %v2566_v42 = vld [vmem:[%s3200_s17 + $0x284] sm:$0xf0]  ;;  %v2555_v43 = vld [vmem:[%s3200_s17 + $0x234] sm:$0xf]  ;;  %v2330_v44 = vor.u32 %v2578_v36, %v2327_v37 }
  0x56   : > { %1046 = vmatpush.bf16.msrb.mxu0 %v2126_v53  ;;  %v2231_v45 = vld [vmem:[%s3200_s17 + $0x288] sm:$0xf0]  ;;  %v2237_v46 = vld [vmem:[%s3200_s17 + $0x238] sm:$0xf]  ;;  %v2567_v47 = vld [vmem:[%s3200_s17 + $0x28c] sm:$0xf0]  ;;  %v2230_v50 = vor.u32 %v2566_v42, %v2229_v41 }
  0x57   : > { %1060 = vmatpush.bf16.msrb.mxu1 %v2130_v54  ;;  %v2556_v48 = vld [vmem:[%s3200_s17 + $0x23c] sm:$0xf]  ;;  %v2239_v49 = vld [vmem:[%s3200_s17 + $0x290] sm:$0xf0]  ;;  %v2234_v51 = vor.u32 %v2555_v43, %v2231_v45  ;;  %v2238_v52 = vor.u32 %v2567_v47, %v2237_v46  ;;  %v2141_v53 = vld [vmem:[%s3200_s17 + $0x180] sm:$0xf] }
  0x58   : > { %1074 = vmatpush.bf16.msrb.mxu2 %v2134_v55  ;;  %1088 = vmatpush.bf16.msrb.mxu3 %v2138_v59  ;;  %v2544_v54 = vld [vmem:[%s3200_s17 + $0x1d4] sm:$0xf0]  ;;  %v2533_v55 = vld [vmem:[%s3200_s17 + $0x184] sm:$0xf]  ;;  %v2242_v56 = vor.u32 %v2556_v48, %v2239_v49  ;;  %v2143_v57 = vld [vmem:[%s3200_s17 + $0x1d8] sm:$0xf0] }
  0x59   : > { %v2149_v58 = vld [vmem:[%s3200_s17 + $0x188] sm:$0xf]  ;;  %v2545_v59 = vld [vmem:[%s3200_s17 + $0x1dc] sm:$0xf0]  ;;  %v2534_v60 = vld [vmem:[%s3200_s17 + $0x18c] sm:$0xf]  ;;  %v2142_v62 = vor.u32 %v2544_v54, %v2141_v53  ;;  %v2146_v63 = vor.u32 %v2533_v55, %v2143_v57 }
  0x5a   : > { %1047 = vmatpush.bf16.msrb.mxu0 %v2038_v1  ;;  %v2151_v61 = vld [vmem:[%s3200_s17 + $0x1e0] sm:$0xf0]  ;;  %v2150_v0 = vor.u32 %v2545_v59, %v2149_v58  ;;  %v2053_v1 = vld [vmem:[%s3200_s17 + $0xd0] sm:$0xf]  ;;  %v2522_v2 = vld [vmem:[%s3200_s17 + $0x124] sm:$0xf0] }
  0x5b   : > { %1061 = vmatpush.bf16.msrb.mxu1 %v2042_v4  ;;  %v2511_v3 = vld [vmem:[%s3200_s17 + $0xd4] sm:$0xf]  ;;  %v2154_v4 = vor.u32 %v2534_v60, %v2151_v61  ;;  %v2061_v6 = vld [vmem:[%s3200_s17 + $0xd8] sm:$0xf]  ;;  %v2523_v7 = vld [vmem:[%s3200_s17 + $0x12c] sm:$0xf0]  ;;  %v2054_v10 = vor.u32 %v2522_v2, %v2053_v1 }
  0x5c   : > { %1075 = vmatpush.bf16.msrb.mxu2 %v2046_v5  ;;  %1089 = vmatpush.bf16.msrb.mxu3 %v2050_v9  ;;  %v2055_v5 = vld [vmem:[%s3200_s17 + $0x128] sm:$0xf0]  ;;  %v2512_v8 = vld [vmem:[%s3200_s17 + $0xdc] sm:$0xf]  ;;  %v2063_v9 = vld [vmem:[%s3200_s17 + $0x130] sm:$0xf0]  ;;  %v2062_v14 = vor.u32 %v2523_v7, %v2061_v6 }
  0x5d   : > { %v1965_v11 = vld [vmem:[%s3200_s17 + $0x20] sm:$0xf]  ;;  %v2500_v12 = vld [vmem:[%s3200_s17 + $0x74] sm:$0xf0]  ;;  %v2058_v13 = vor.u32 %v2511_v3, %v2055_v5  ;;  %v2489_v15 = vld [vmem:[%s3200_s17 + $0x24] sm:$0xf]  ;;  %v2066_v19 = vor.u32 %v2512_v8, %v2063_v9 }
  0x5e   : > { %1048 = vmatpush.bf16.msrb.mxu0 %v1950_v16  ;;  %v1967_v16 = vld [vmem:[%s3200_s17 + $0x78] sm:$0xf0]  ;;  %v1973_v18 = vld [vmem:[%s3200_s17 + $0x28] sm:$0xf]  ;;  %v2501_v20 = vld [vmem:[%s3200_s17 + $0x7c] sm:$0xf0] }
  0x5f   : > { %1062 = vmatpush.bf16.msrb.mxu1 %v1954_v21  ;;  %v2490_v21 = vld [vmem:[%s3200_s17 + $0x2c] sm:$0xf]  ;;  %v2421_v23 = vld [vmem:[%s3200_s17 + $0x3a0] sm:$0xf]  ;;  %v2612_v24 = vld [vmem:[%s3200_s17 + $0x3f4] sm:$0xf0]  ;;  %v1970_v30 = vor.u32 %v2489_v15, %v1967_v16  ;;  %v1974_v31 = vor.u32 %v2501_v20, %v1973_v18 }
  0x60   : > { %1076 = vmatpush.bf16.msrb.mxu2 %v1958_v22  ;;  %1090 = vmatpush.bf16.msrb.mxu3 %v1962_v25  ;;  %v1975_v22 = vld [vmem:[%s3200_s17 + $0x80] sm:$0xf0]  ;;  %v2613_v29 = vld [vmem:[%s3200_s17 + $0x3fc] sm:$0xf0]  ;;  %v2422_v35 = vor.u32 %v2612_v24, %v2421_v23  ;;  %v2335_v42 = vld [vmem:[%s3200_s17 + $0x348] sm:$0xf0] }
  0x61   : > { %2463 = vmatmul.msk.bf16.vlgmr.msrb.gmra.mxu0 %vm981_vm0, %v3266_v17  ;;  %v2601_v25 = vld [vmem:[%s3200_s17 + $0x3a4] sm:$0xf]  ;;  %v1978_v34 = vor.u32 %v2490_v21, %v1975_v22  ;;  %v2341_v43 = vld [vmem:[%s3200_s17 + $0x2f8] sm:$0xf]  ;;  %v2580_v45 = vld [vmem:[%s3200_s17 + $0x2fc] sm:$0xf] }
  0x62   : > { %1099 = vmatpush.bf16.msra.mxu0 %v2406_v26  ;;  %2464 = vmatmul.msk.bf16.vlgmr.msrb.gmra.mxu1 %vm981_vm0, %v3266_v17  ;;  %v1966_v26 = vor.u32 %v2500_v12, %v1965_v11  ;;  %v2431_v33 = vld [vmem:[%s3200_s17 + $0x400] sm:$0xf0]  ;;  %v2343_v46 = vld [vmem:[%s3200_s17 + $0x350] sm:$0xf0]  ;;  %v2247_v54 = vld [vmem:[%s3200_s17 + $0x298] sm:$0xf0] }
  0x63   : > { %1113 = vmatpush.bf16.msra.mxu1 %v2410_v27  ;;  %2465 = vmatmul.msk.bf16.vlgmr.msrb.gmra.mxu2 %vm981_vm0, %v3266_v17  ;;  %v2423_v27 = vld [vmem:[%s3200_s17 + $0x3f8] sm:$0xf0]  ;;  %v2346_v53 = vor.u32 %v2580_v45, %v2343_v46  ;;  %v2253_v55 = vld [vmem:[%s3200_s17 + $0x248] sm:$0xf]  ;;  %v2558_v57 = vld [vmem:[%s3200_s17 + $0x24c] sm:$0xf] }
  0x64   : > { %1127 = vmatpush.bf16.msra.mxu2 %v2414_v28  ;;  %1141 = vmatpush.bf16.msra.mxu3 %v2418_v32  ;;  %v2429_v28 = vld [vmem:[%s3200_s17 + $0x3a8] sm:$0xf]  ;;  %v2602_v32 = vld [vmem:[%s3200_s17 + $0x3ac] sm:$0xf]  ;;  %v2426_v36 = vor.u32 %v2601_v25, %v2423_v27  ;;  %v2255_v58 = vld [vmem:[%s3200_s17 + $0x2a0] sm:$0xf0] }
  0x65   : > { %2466 = vmatmul.msk.bf16.vlgmr.msrb.gmra.mxu3 %vm981_vm0, %v3266_v17  ;;  %v2430_v37 = vor.u32 %v2613_v29, %v2429_v28  ;;  %v2434_v41 = vor.u32 %v2602_v32, %v2431_v33  ;;  %v2258_v1 = vor.u32 %v2558_v57, %v2255_v58  ;;  %v2159_v2 = vld [vmem:[%s3200_s17 + $0x1e8] sm:$0xf0]  ;;  %v2165_v3 = vld [vmem:[%s3200_s17 + $0x198] sm:$0xf]  ;;  %v2536_v5 = vld [vmem:[%s3200_s17 + $0x19c] sm:$0xf] }
  0x66   : > { %1100 = vmatpush.bf16.msra.mxu0 %v2318_v38  ;;  %v2333_v38 = vld [vmem:[%s3200_s17 + $0x2f0] sm:$0xf]  ;;  %v2167_v6 = vld [vmem:[%s3200_s17 + $0x1f0] sm:$0xf0]  ;;  %v2524_v11 = vld [vmem:[%s3200_s17 + $0x134] sm:$0xf0] }
  0x67   : > { %1114 = vmatpush.bf16.msra.mxu1 %v2322_v39  ;;  %v2590_v39 = vld [vmem:[%s3200_s17 + $0x344] sm:$0xf0]  ;;  %v2513_v12 = vld [vmem:[%s3200_s17 + $0xe4] sm:$0xf]  ;;  %v2525_v16 = vld [vmem:[%s3200_s17 + $0x13c] sm:$0xf0] }
  0x68   : > { %1128 = vmatpush.bf16.msra.mxu2 %v2326_v40  ;;  %1142 = vmatpush.bf16.msra.mxu3 %v2330_v44  ;;  %v2579_v40 = vld [vmem:[%s3200_s17 + $0x2f4] sm:$0xf]  ;;  %v2591_v44 = vld [vmem:[%s3200_s17 + $0x34c] sm:$0xf0]  ;;  %v2334_v47 = vor.u32 %v2590_v39, %v2333_v38  ;;  %v2077_v15 = vld [vmem:[%s3200_s17 + $0xe8] sm:$0xf] }
  0x69   : > { %v2338_v48 = vor.u32 %v2579_v40, %v2335_v42  ;;  %v2342_v49 = vor.u32 %v2591_v44, %v2341_v43  ;;  %v2514_v18 = vld [vmem:[%s3200_s17 + $0xec] sm:$0xf]  ;;  %v1981_v21 = vld [vmem:[%s3200_s17 + $0x30] sm:$0xf]  ;;  %v2502_v22 = vld [vmem:[%s3200_s17 + $0x84] sm:$0xf0]  ;;  %v2078_v24 = vor.u32 %v2525_v16, %v2077_v15 }
  0x6a   : > { %1101 = vmatpush.bf16.msra.mxu0 %v2230_v50  ;;  %v2245_v50 = vld [vmem:[%s3200_s17 + $0x240] sm:$0xf]  ;;  %v2491_v25 = vld [vmem:[%s3200_s17 + $0x34] sm:$0xf]  ;;  %v1989_v27 = vld [vmem:[%s3200_s17 + $0x38] sm:$0xf] }
  0x6b   : > { %1115 = vmatpush.bf16.msra.mxu1 %v2234_v51  ;;  %v2568_v51 = vld [vmem:[%s3200_s17 + $0x294] sm:$0xf0]  ;;  %v2503_v29 = vld [vmem:[%s3200_s17 + $0x8c] sm:$0xf0]  ;;  %v2614_v33 = vld [vmem:[%s3200_s17 + $0x404] sm:$0xf0] }
  0x6c   : > { %1129 = vmatpush.bf16.msra.mxu2 %v2238_v52  ;;  %1143 = vmatpush.bf16.msra.mxu3 %v2242_v56  ;;  %v2557_v52 = vld [vmem:[%s3200_s17 + $0x244] sm:$0xf]  ;;  %v2569_v56 = vld [vmem:[%s3200_s17 + $0x29c] sm:$0xf0]  ;;  %v2246_v59 = vor.u32 %v2568_v51, %v2245_v50  ;;  %v2437_v32 = vld [vmem:[%s3200_s17 + $0x3b0] sm:$0xf]  ;;  %v1990_v40 = vor.u32 %v2503_v29, %v1989_v27 }
  0x6d   : > { %v2250_v60 = vor.u32 %v2557_v52, %v2247_v54  ;;  %v2254_v61 = vor.u32 %v2569_v56, %v2253_v55  ;;  %v2615_v38 = vld [vmem:[%s3200_s17 + $0x40c] sm:$0xf0]  ;;  %v2447_v42 = vld [vmem:[%s3200_s17 + $0x410] sm:$0xf0]  ;;  %v2438_v44 = vor.u32 %v2614_v33, %v2437_v32  ;;  %v2351_v51 = vld [vmem:[%s3200_s17 + $0x358] sm:$0xf0] }
  0x6e   : > { %1102 = vmatpush.bf16.msra.mxu0 %v2142_v62  ;;  %v2157_v62 = vld [vmem:[%s3200_s17 + $0x190] sm:$0xf]  ;;  %v2357_v52 = vld [vmem:[%s3200_s17 + $0x308] sm:$0xf]  ;;  %v2582_v54 = vld [vmem:[%s3200_s17 + $0x30c] sm:$0xf] }
  0x6f   : > { %1116 = vmatpush.bf16.msra.mxu1 %v2146_v63  ;;  %v2546_v63 = vld [vmem:[%s3200_s17 + $0x1e4] sm:$0xf0]  ;;  %v2359_v55 = vld [vmem:[%s3200_s17 + $0x360] sm:$0xf0]  ;;  %v2516_v27 = vld [vmem:[%s3200_s17 + $0xfc] sm:$0xf] }
  0x70   : > { %1130 = vmatpush.bf16.msra.mxu2 %v2150_v0  ;;  %1144 = vmatpush.bf16.msra.mxu3 %v2154_v4  ;;  %v2535_v0 = vld [vmem:[%s3200_s17 + $0x194] sm:$0xf]  ;;  %v2547_v4 = vld [vmem:[%s3200_s17 + $0x1ec] sm:$0xf0]  ;;  %v2158_v7 = vor.u32 %v2546_v63, %v2157_v62  ;;  %v2362_v62 = vor.u32 %v2582_v54, %v2359_v55  ;;  %v2263_v63 = vld [vmem:[%s3200_s17 + $0x2a8] sm:$0xf0] }
  0x71   : > { %v2162_v8 = vor.u32 %v2535_v0, %v2159_v2  ;;  %v2166_v9 = vor.u32 %v2547_v4, %v2165_v3  ;;  %v2269_v0 = vld [vmem:[%s3200_s17 + $0x258] sm:$0xf]  ;;  %v2560_v2 = vld [vmem:[%s3200_s17 + $0x25c] sm:$0xf]  ;;  %v2271_v3 = vld [vmem:[%s3200_s17 + $0x2b0] sm:$0xf0] }
  0x72   : > { %1103 = vmatpush.bf16.msra.mxu0 %v2054_v10  ;;  %v2069_v10 = vld [vmem:[%s3200_s17 + $0xe0] sm:$0xf]  ;;  %v2183_v15 = vld [vmem:[%s3200_s17 + $0x200] sm:$0xf0]  ;;  %v2504_v33 = vld [vmem:[%s3200_s17 + $0x94] sm:$0xf0] }
  0x73   : > { %1117 = vmatpush.bf16.msra.mxu1 %v2058_v13  ;;  %v2170_v13 = vor.u32 %v2536_v5, %v2167_v6  ;;  %v2070_v20 = vor.u32 %v2524_v11, %v2069_v10  ;;  %v2274_v10 = vor.u32 %v2560_v2, %v2271_v3  ;;  %v2175_v11 = vld [vmem:[%s3200_s17 + $0x1f8] sm:$0xf0]  ;;  %v2367_v54 = vld [vmem:[%s3200_s17 + $0x368] sm:$0xf0]  ;;  %s2620_s15 = smul.u32 352, %s3196_s5  ;;  %s3029_s3 = scalar_lea.hbm %s3813_s2, 704 }
  0x74   : > { %1131 = vmatpush.bf16.msra.mxu2 %v2062_v14  ;;  %1145 = vmatpush.bf16.msra.mxu3 %v2066_v19  ;;  %v2071_v14 = vld [vmem:[%s3200_s17 + $0x138] sm:$0xf0]  ;;  %v2079_v19 = vld [vmem:[%s3200_s17 + $0x140] sm:$0xf0]  ;;  %v2191_v2 = vld [vmem:[%s3200_s17 + $0x208] sm:$0xf0] }
  0x75   : > { %v2074_v23 = vor.u32 %v2513_v12, %v2071_v14  ;;  %v2082_v28 = vor.u32 %v2514_v18, %v2079_v19  ;;  %v2181_v12 = vld [vmem:[%s3200_s17 + $0x1a8] sm:$0xf]  ;;  %v2538_v14 = vld [vmem:[%s3200_s17 + $0x1ac] sm:$0xf]  ;;  %s3569_s20 = scalar_lea.vmem [#allocation7], %s2620_s15  ;;  %s2621_s8 = smul.u32 352, %s3124_s13 }
  0x76   : > { %1104 = vmatpush.bf16.msra.mxu0 %v1966_v26  ;;  %v1983_v26 = vld [vmem:[%s3200_s17 + $0x88] sm:$0xf0]  ;;  %s1834_s21 = sshll.u32 %s3569_s20, 4  ;;  %s1822_s13 = scalar_lea.sflag [#allocation4], %s3196_s5  ;;  %s1835_s21 = int_to_ptr.vmem [resolvable:$true] %s1834_s21 }
  0x77   : > { %1118 = vmatpush.bf16.msra.mxu1 %v1970_v30  ;;  %v2492_v30 = vld [vmem:[%s3200_s17 + $0x3c] sm:$0xf]  ;;  %v1986_v39 = vor.u32 %v2491_v25, %v1983_v26  ;;  %v2093_v25 = vld [vmem:[%s3200_s17 + $0xf8] sm:$0xf]  ;;  %v2527_v26 = vld [vmem:[%s3200_s17 + $0x14c] sm:$0xf0]  ;;  %s1833_s19 = scalar_lea.hbm %s3813_s2, %s2621_s8 }
  0x78   : > { %1132 = vmatpush.bf16.msra.mxu2 %v1974_v31  ;;  %1146 = vmatpush.bf16.msra.mxu3 %v1978_v34  ;;  %v1991_v31 = vld [vmem:[%s3200_s17 + $0x90] sm:$0xf0]  ;;  %v2094_v32 = vor.u32 %v2527_v26, %v2093_v25  ;;  %s1836_s22 = sshll.u32 %s1833_s19, 4  ;;  %s1837_s22 = int_to_ptr.hbm [resolvable:$true] %s1836_s22 }
  0x79   : > { %2467 = vmatmul.msk.bf16.vlgmr.msra.gmra.mxu0 %vm981_vm0, %v3266_v17  ;;  %v2603_v34 = vld [vmem:[%s3200_s17 + $0x3b4] sm:$0xf]  ;;  %v1994_v43 = vor.u32 %v2492_v30, %v1991_v31  ;;  %v1997_v30 = vld [vmem:[%s3200_s17 + $0x40] sm:$0xf]  ;;  %s3023_s24 = sshra.s32 %s1837_s22, 4  ;;  %s3024_s24 = int_to_ptr.hbm [resolvable:$true] %s3023_s24 }
  0x7a   : > { %1155 = vmatpush.bf16.msrb.mxu0 %v2422_v35  ;;  %2468 = vmatmul.msk.bf16.vlgmr.msra.gmra.mxu1 %vm981_vm0, %v3266_v17  ;;  %v1982_v35 = vor.u32 %v2502_v22, %v1981_v21  ;;  %v2526_v21 = vld [vmem:[%s3200_s17 + $0x144] sm:$0xf0]  ;;  %v2515_v22 = vld [vmem:[%s3200_s17 + $0xf4] sm:$0xf]  ;;  %s3025_s25 = scalar_lea.hbm %s3024_s24, 352  ;;  %p3030_p11 = scmp.lt.s32.totalorder %s3024_s24, %s3813_s2 }
  0x7b   : > { %1169 = vmatpush.bf16.msrb.mxu1 %v2426_v36  ;;  %2469 = vmatmul.msk.bf16.vlgmr.msra.gmra.mxu2 %vm981_vm0, %v3266_v17  ;;  %v2439_v36 = vld [vmem:[%s3200_s17 + $0x408] sm:$0xf0]  ;;  %p3026_p1 = scmp.ne.s32.totalorder %s3024_s24, %s3025_s25  ;;  %p3031_p9 = scmp.lt.s32.totalorder %s3029_s3, %s3025_s25 }
  0x7c   : > { %1183 = vmatpush.bf16.msrb.mxu2 %v2430_v37  ;;  %1197 = vmatpush.bf16.msrb.mxu3 %v2434_v41  ;;  %v2445_v37 = vld [vmem:[%s3200_s17 + $0x3b8] sm:$0xf]  ;;  %v2604_v41 = vld [vmem:[%s3200_s17 + $0x3bc] sm:$0xf]  ;;  %v2442_v45 = vor.u32 %v2603_v34, %v2439_v36  ;;  %v2493_v34 = vld [vmem:[%s3200_s17 + $0x44] sm:$0xf] }
  0x7d   : > { %2470 = vmatmul.msk.bf16.vlgmr.msra.gmra.mxu3 %vm981_vm0, %v3266_v17  ;;  %v2446_v46 = vor.u32 %v2615_v38, %v2445_v37  ;;  %v2450_v50 = vor.u32 %v2604_v41, %v2447_v42  ;;  %v2005_v37 = vld [vmem:[%s3200_s17 + $0x48] sm:$0xf]  ;;  %v2505_v38 = vld [vmem:[%s3200_s17 + $0x9c] sm:$0xf0]  ;;  %v2616_v42 = vld [vmem:[%s3200_s17 + $0x414] sm:$0xf0]  ;;  %p3027_p4 = pnand %p3026_p1, %p3170_p7  ;;  %p3032_p2 = por %p3031_p9, %p3030_p11 }
  0x7e   : > { %1156 = vmatpush.bf16.msrb.mxu0 %v2334_v47  ;;  %v2349_v47 = vld [vmem:[%s3200_s17 + $0x300] sm:$0xf] }
  0x7f   : > { %1170 = vmatpush.bf16.msrb.mxu1 %v2338_v48  ;;  %v2592_v48 = vld [vmem:[%s3200_s17 + $0x354] sm:$0xf0]  ;;  %v2453_v41 = vld [vmem:[%s3200_s17 + $0x3c0] sm:$0xf]  ;;  %p3028_p8 = pneg %p3027_p4 }
  0x80   : > { %1184 = vmatpush.bf16.msrb.mxu2 %v2342_v49  ;;  %1198 = vmatpush.bf16.msrb.mxu3 %v2346_v53  ;;  %v2581_v49 = vld [vmem:[%s3200_s17 + $0x304] sm:$0xf]  ;;  %v2593_v53 = vld [vmem:[%s3200_s17 + $0x35c] sm:$0xf0]  ;;  %v2350_v56 = vor.u32 %v2592_v48, %v2349_v47  ;;  %v2006_v47 = vor.u32 %v2505_v38, %v2005_v37 }
  0x81   : > { %v2354_v57 = vor.u32 %v2581_v49, %v2351_v51  ;;  %v2358_v58 = vor.u32 %v2593_v53, %v2357_v52  ;;  %v2454_v49 = vor.u32 %v2616_v42, %v2453_v41  ;;  %v2365_v51 = vld [vmem:[%s3200_s17 + $0x310] sm:$0xf]  ;;  %v2594_v52 = vld [vmem:[%s3200_s17 + $0x364] sm:$0xf0]  ;;  %v2583_v53 = vld [vmem:[%s3200_s17 + $0x314] sm:$0xf]  ;;  %p3033_p10 = pnand %p3032_p2, %p3028_p8 }
  0x82   : > { %1157 = vmatpush.bf16.msrb.mxu0 %v2246_v59  ;;  %v2261_v59 = vld [vmem:[%s3200_s17 + $0x250] sm:$0xf]  ;;  %v2366_v55 = vor.u32 %v2594_v52, %v2365_v51 }
  0x83   : > { %1171 = vmatpush.bf16.msrb.mxu1 %v2250_v60  ;;  %v2570_v60 = vld [vmem:[%s3200_s17 + $0x2a4] sm:$0xf0] }
  0x84   : > { %1185 = vmatpush.bf16.msrb.mxu2 %v2254_v61  ;;  %1199 = vmatpush.bf16.msrb.mxu3 %v2258_v1  ;;  %v2559_v61 = vld [vmem:[%s3200_s17 + $0x254] sm:$0xf]  ;;  %v2571_v1 = vld [vmem:[%s3200_s17 + $0x2ac] sm:$0xf0]  ;;  %v2262_v4 = vor.u32 %v2570_v60, %v2261_v59  ;;  %v2561_v59 = vld [vmem:[%s3200_s17 + $0x264] sm:$0xf] }
  0x85   : > { %v2266_v5 = vor.u32 %v2559_v61, %v2263_v63  ;;  %v2270_v6 = vor.u32 %v2571_v1, %v2269_v0  ;;  %v2279_v60 = vld [vmem:[%s3200_s17 + $0x2b8] sm:$0xf0]  ;;  %v2189_v63 = vld [vmem:[%s3200_s17 + $0x1b0] sm:$0xf]  ;;  %v2550_v0 = vld [vmem:[%s3200_s17 + $0x204] sm:$0xf0] }
  0x86   : > { %1158 = vmatpush.bf16.msrb.mxu0 %v2158_v7  ;;  %v2173_v7 = vld [vmem:[%s3200_s17 + $0x1a0] sm:$0xf]  ;;  %v2539_v1 = vld [vmem:[%s3200_s17 + $0x1b4] sm:$0xf]  ;;  %v2190_v3 = vor.u32 %v2550_v0, %v2189_v63 }
  0x87   : > { %1172 = vmatpush.bf16.msrb.mxu1 %v2162_v8  ;;  %v2548_v8 = vld [vmem:[%s3200_s17 + $0x1f4] sm:$0xf0] }
  0x88   : > { %1186 = vmatpush.bf16.msrb.mxu2 %v2166_v9  ;;  %1200 = vmatpush.bf16.msrb.mxu3 %v2170_v13  ;;  %v2537_v9 = vld [vmem:[%s3200_s17 + $0x1a4] sm:$0xf]  ;;  %v2549_v13 = vld [vmem:[%s3200_s17 + $0x1fc] sm:$0xf0]  ;;  %v2174_v16 = vor.u32 %v2548_v8, %v2173_v7  ;;  %v2103_v8 = vld [vmem:[%s3200_s17 + $0x158] sm:$0xf0] }
  0x89   : > { %v2178_v18 = vor.u32 %v2537_v9, %v2175_v11  ;;  %v2182_v19 = vor.u32 %v2549_v13, %v2181_v12  ;;  %v2517_v7 = vld [vmem:[%s3200_s17 + $0x104] sm:$0xf]  ;;  %v2013_v11 = vld [vmem:[%s3200_s17 + $0x50] sm:$0xf]  ;;  %v2506_v12 = vld [vmem:[%s3200_s17 + $0xa4] sm:$0xf0] }
  0x8a   : > { %1159 = vmatpush.bf16.msrb.mxu0 %v2070_v20  ;;  %v2085_v20 = vld [vmem:[%s3200_s17 + $0xf0] sm:$0xf]  ;;  %v2495_v13 = vld [vmem:[%s3200_s17 + $0x54] sm:$0xf] }
  0x8b   : > { %1173 = vmatpush.bf16.msrb.mxu1 %v2074_v23  ;;  %v2186_v23 = vor.u32 %v2538_v14, %v2183_v15  ;;  %v2086_v29 = vor.u32 %v2526_v21, %v2085_v20  ;;  %v2015_v14 = vld [vmem:[%s3200_s17 + $0xa8] sm:$0xf0]  ;;  %v2014_v15 = vor.u32 %v2506_v12, %v2013_v11 }
  0x8c   : > { %1187 = vmatpush.bf16.msrb.mxu2 %v2078_v24  ;;  %1201 = vmatpush.bf16.msrb.mxu3 %v2082_v28  ;;  %v2087_v24 = vld [vmem:[%s3200_s17 + $0x148] sm:$0xf0]  ;;  %v2095_v28 = vld [vmem:[%s3200_s17 + $0x150] sm:$0xf0] }
  0x8d   : > { %v2090_v31 = vor.u32 %v2515_v22, %v2087_v24  ;;  %v2098_v36 = vor.u32 %v2516_v27, %v2095_v28 }
  0x8e   : > { %1160 = vmatpush.bf16.msrb.mxu0 %v1982_v35  ;;  %v1999_v35 = vld [vmem:[%s3200_s17 + $0x98] sm:$0xf0] }
  0x8f   : > { %1174 = vmatpush.bf16.msrb.mxu1 %v1986_v39  ;;  %v2494_v39 = vld [vmem:[%s3200_s17 + $0x4c] sm:$0xf] }
  0x90   : > { %1188 = vmatpush.bf16.msrb.mxu2 %v1990_v40  ;;  %1202 = vmatpush.bf16.msrb.mxu3 %v1994_v43  ;;  %v2007_v40 = vld [vmem:[%s3200_s17 + $0xa0] sm:$0xf0]  ;;  %v1998_v43 = vor.u32 %v2504_v33, %v1997_v30 }
  0x91   : > { %2471 = vmatmul.msk.bf16.vlgmr.msrb.gmra.mxu0 %vm981_vm0, %v3266_v17  ;;  %v2010_v48 = vor.u32 %v2494_v39, %v2007_v40 }
  0x92   : > { %1211 = vmatpush.bf16.msra.mxu0 %v2438_v44  ;;  %2472 = vmatmul.msk.bf16.vlgmr.msrb.gmra.mxu1 %vm981_vm0, %v3266_v17  ;;  %v2605_v44 = vld [vmem:[%s3200_s17 + $0x3c4] sm:$0xf] }
  0x93   : > { %1225 = vmatpush.bf16.msra.mxu1 %v2442_v45  ;;  %2473 = vmatmul.msk.bf16.vlgmr.msrb.gmra.mxu2 %vm981_vm0, %v3266_v17  ;;  %v2455_v45 = vld [vmem:[%s3200_s17 + $0x418] sm:$0xf0] }
  0x94   : > { %1239 = vmatpush.bf16.msra.mxu2 %v2446_v46  ;;  %1253 = vmatpush.bf16.msra.mxu3 %v2450_v50  ;;  %v2002_v46 = vor.u32 %v2493_v34, %v1999_v35  ;;  %v2458_v50 = vor.u32 %v2605_v44, %v2455_v45 }
  0x95   : > { %2474 = vmatmul.msk.bf16.vlgmr.msrb.gmra.mxu3 %vm981_vm0, %v3266_v17 }
  0x96   : > { %1212 = vmatpush.bf16.msra.mxu0 %v2350_v56  ;;  %v2370_v56 = vor.u32 %v2583_v53, %v2367_v54 }
  0x97   : > { %1226 = vmatpush.bf16.msra.mxu1 %v2354_v57  ;;  %v2277_v57 = vld [vmem:[%s3200_s17 + $0x260] sm:$0xf] }
  0x98   : > { %1240 = vmatpush.bf16.msra.mxu2 %v2358_v58  ;;  %1254 = vmatpush.bf16.msra.mxu3 %v2362_v62  ;;  %v2572_v58 = vld [vmem:[%s3200_s17 + $0x2b4] sm:$0xf0]  ;;  %v2282_v62 = vor.u32 %v2561_v59, %v2279_v60 }
  0x99   : > { %v2278_v61 = vor.u32 %v2572_v58, %v2277_v57 }
  0x9a   : > { %1213 = vmatpush.bf16.msra.mxu0 %v2262_v4  ;;  %v2194_v4 = vor.u32 %v2539_v1, %v2191_v2 }
  0x9b   : > { %1227 = vmatpush.bf16.msra.mxu1 %v2266_v5  ;;  %v2101_v5 = vld [vmem:[%s3200_s17 + $0x100] sm:$0xf] }
  0x9c   : > { %1241 = vmatpush.bf16.msra.mxu2 %v2270_v6  ;;  %1255 = vmatpush.bf16.msra.mxu3 %v2274_v10  ;;  %v2528_v6 = vld [vmem:[%s3200_s17 + $0x154] sm:$0xf0]  ;;  %v2106_v10 = vor.u32 %v2517_v7, %v2103_v8 }
  0x9d   : > { %v2102_v9 = vor.u32 %v2528_v6, %v2101_v5 }
  0x9e   : > { %1214 = vmatpush.bf16.msra.mxu0 %v2174_v16  ;;  %v2018_v16 = vor.u32 %v2495_v13, %v2015_v14 }
  0x9f   : > { %1228 = vmatpush.bf16.msra.mxu1 %v2178_v18 }
  0xa0   : > { %1242 = vmatpush.bf16.msra.mxu2 %v2182_v19  ;;  %1256 = vmatpush.bf16.msra.mxu3 %v2186_v23 }
  0xa2   : > { %1215 = vmatpush.bf16.msra.mxu0 %v2086_v29 }
  0xa3   : > { %1229 = vmatpush.bf16.msra.mxu1 %v2090_v31 }
  0xa4   : > { %1243 = vmatpush.bf16.msra.mxu2 %v2094_v32  ;;  %1257 = vmatpush.bf16.msra.mxu3 %v2098_v36 }
  0xa6   : > { %1216 = vmatpush.bf16.msra.mxu0 %v1998_v43 }
  0xa7   : > { %1230 = vmatpush.bf16.msra.mxu1 %v2002_v46 }
  0xa8   : > { %1244 = vmatpush.bf16.msra.mxu2 %v2006_v47  ;;  %1258 = vmatpush.bf16.msra.mxu3 %v2010_v48 }
  0xa9   : > { %2475 = vmatmul.msk.bf16.vlgmr.msra.gmra.mxu0 %vm981_vm0, %v3266_v17 }
  0xaa   : > { %1267 = vmatpush.bf16.msrb.mxu0 %v2454_v49  ;;  %2476 = vmatmul.msk.bf16.vlgmr.msra.gmra.mxu1 %vm981_vm0, %v3266_v17 }
  0xab   : > { %1281 = vmatpush.bf16.msrb.mxu1 %v2458_v50  ;;  %2477 = vmatmul.msk.bf16.vlgmr.msra.gmra.mxu2 %vm981_vm0, %v3266_v17 }
  0xac   : > { %2478 = vmatmul.msk.bf16.vlgmr.msra.gmra.mxu3 %vm981_vm0, %v3266_v17 }
  0xae   : > { %1268 = vmatpush.bf16.msrb.mxu0 %v2366_v55 }
  0xaf   : > { %1282 = vmatpush.bf16.msrb.mxu1 %v2370_v56 }
  0xb2   : > { %1269 = vmatpush.bf16.msrb.mxu0 %v2278_v61 }
  0xb3   : > { %1283 = vmatpush.bf16.msrb.mxu1 %v2282_v62 }
  0xb6   : > { %1270 = vmatpush.bf16.msrb.mxu0 %v2190_v3 }
  0xb7   : > { %1284 = vmatpush.bf16.msrb.mxu1 %v2194_v4 }
  0xba   : > { %1271 = vmatpush.bf16.msrb.mxu0 %v2102_v9 }
  0xbb   : > { %1285 = vmatpush.bf16.msrb.mxu1 %v2106_v10 }
  0xbe   : > { %1272 = vmatpush.bf16.msrb.mxu0 %v2014_v15 }
  0xbf   : > { %1286 = vmatpush.bf16.msrb.mxu1 %v2018_v16 }
  0xc1   : > { %2479 = vmatmul.msk.bf16.vlgmr.msrb.gmra.mxu0 %vm981_vm0, %v3266_v17 }
  0xc2   : > { %2480 = vmatmul.msk.bf16.vlgmr.msrb.gmra.mxu1 %vm981_vm0, %v3266_v17 }
  0xc6   : > { %v3520_v18 = vpop.f32.mrf.mxu0 }
  0xc7   : > { %v1293_v19 = vmin.f32 %v3520_v18, 20.0  ;;  %v3523_v20 = vpop.f32.mrf.mxu1 }
  0xc8   : > { %v1294_v21 = vmin.f32 %v3523_v20, 20.0 }
  0xc9   : > { %v1337_v22 = vmul.f32 1.442695, %v1293_v19 }
  0xca   : > { %v1339_v23 = vmul.f32 1.442695, %v1294_v21 }
  0xcb   : > { %2685 = vpow2.f32 %v1337_v22 }
  0xcc   : > { %2687 = vpow2.f32 %v1339_v23 }
  0xce   : > { %v3526_v24 = vpop.f32.mrf.mxu2  ;;  %v3531_v27 = vpop.f32.mrf.mxu0 }
  0xcf   : > { %v1295_v25 = vmin.f32 %v3526_v24, 20.0  ;;  %v1315_v28 = vmin.f32 %v3531_v27, 20.0  ;;  %v3535_v29 = vpop.f32.mrf.mxu1 }
  0xd0   : > { %v3529_v26 = vpop.f32.mrf.mxu3  ;;  %v1316_v31 = vmin.f32 %v3535_v29, 20.0 }
  0xd1   : > { %v1296_v17 = vmin.f32 %v3529_v26, 20.0  ;;  %v1341_v30 = vmul.f32 1.442695, %v1295_v25  ;;  %v2686_v32 = vpop.eup %2685  ;;  %v1381_v34 = vmul.f32 1.442695, %v1315_v28 }
  0xd2   : > { %v2688_v35 = vpop.eup %2687  ;;  %v1425_v36 = vmul.f32 %v2686_v32, %v2686_v32  ;;  %v1469_v37 = vmul.f32 2.0, %v2686_v32  ;;  %v1383_v38 = vmul.f32 1.442695, %v1316_v31 }
  0xd3   : > { %v1343_v33 = vmul.f32 1.442695, %v1296_v17  ;;  %2689 = vpow2.f32 %v1341_v30  ;;  %v1426_v39 = vmul.f32 %v2688_v35, %v2688_v35  ;;  %v1470_v40 = vmul.f32 2.0, %v2688_v35 }
  0xd4   : > { %v1513_v41 = vadd.f32 %v1469_v37, %v1425_v36 }
  0xd5   : > { %2691 = vpow2.f32 %v1343_v33  ;;  %v1514_v42 = vadd.f32 %v1470_v40, %v1426_v39 }
  0xd6   : > { %2693 = vpow2.f32 %v1381_v34  ;;  %v3538_v43 = vpop.f32.mrf.mxu2  ;;  %v1557_v44 = vadd.f32 2.0, %v1513_v41 }
  0xd7   : > { %2695 = vpow2.f32 %v1383_v38  ;;  %v1317_v45 = vmin.f32 %v3538_v43, 20.0  ;;  %v1558_v47 = vadd.f32 2.0, %v1514_v42 }
  0xd8   : > { %v3541_v46 = vpop.f32.mrf.mxu3  ;;  %2697 = vrcp.f32 %v1557_v44 }
  0xd9   : > { %v1318_v48 = vmin.f32 %v3541_v46, 20.0  ;;  %v2690_v49 = vpop.eup %2689  ;;  %v1385_v50 = vmul.f32 1.442695, %v1317_v45  ;;  %2699 = vrcp.f32 %v1558_v47 }
  0xda   : > { %v1427_v52 = vmul.f32 %v2690_v49, %v2690_v49  ;;  %v1471_v53 = vmul.f32 2.0, %v2690_v49 }
  0xdb   : > { %v2692_v51 = vpop.eup %2691  ;;  %v1387_v54 = vmul.f32 1.442695, %v1318_v48  ;;  %2701 = vpow2.f32 %v1385_v50 }
  0xdc   : > { %v2694_v55 = vpop.eup %2693  ;;  %v1428_v56 = vmul.f32 %v2692_v51, %v2692_v51  ;;  %v1472_v57 = vmul.f32 2.0, %v2692_v51  ;;  %v1515_v59 = vadd.f32 %v1471_v53, %v1427_v52 }
  0xdd   : > { %v2696_v58 = vpop.eup %2695  ;;  %v1447_v60 = vmul.f32 %v2694_v55, %v2694_v55  ;;  %v1491_v61 = vmul.f32 2.0, %v2694_v55  ;;  %2703 = vpow2.f32 %v1387_v54 }
  0xde   : > { %v1516_v62 = vadd.f32 %v1472_v57, %v1428_v56  ;;  %v1448_v63 = vmul.f32 %v2696_v58, %v2696_v58  ;;  %v1492_v0 = vmul.f32 2.0, %v2696_v58  ;;  %v3544_v1 = vpop.f32.mrf.mxu0  ;;  %v1559_v2 = vadd.f32 2.0, %v1515_v59  ;;  %v2698_v6 = vpop.eup %2697 }
  0xdf   : > { %v1535_v3 = vadd.f32 %v1491_v61, %v1447_v60  ;;  %v1297_v4 = vmin.f32 %v3544_v1, 20.0  ;;  %v3547_v5 = vpop.f32.mrf.mxu1  ;;  %v2700_v10 = vpop.eup %2699  ;;  %v1645_v11 = vmul.f32 %v2698_v6, %v1513_v41 }
  0xe0   : > { %v1560_v7 = vadd.f32 2.0, %v1516_v62  ;;  %v1536_v8 = vadd.f32 %v1492_v0, %v1448_v63  ;;  %v1298_v9 = vmin.f32 %v3547_v5, 20.0  ;;  %2705 = vrcp.f32 %v1559_v2 }
  0xe1   : > { %v1579_v12 = vadd.f32 2.0, %v1535_v3  ;;  %v1345_v13 = vmul.f32 1.442695, %v1297_v4  ;;  %v2702_v14 = vpop.eup %2701  ;;  %v1646_v15 = vmul.f32 %v2700_v10, %v1514_v42  ;;  %v1689_v22 = vmul.f32 %v1645_v11, %v3520_v18 }
  0xe2   : > { %2707 = vrcp.f32 %v1560_v7  ;;  %v1580_v16 = vadd.f32 2.0, %v1536_v8  ;;  %v1347_v19 = vmul.f32 1.442695, %v1298_v9  ;;  %v1449_v23 = vmul.f32 %v2702_v14, %v2702_v14 }
  0xe3   : > { %v2704_v21 = vpop.eup %2703  ;;  %2709 = vrcp.f32 %v1579_v12  ;;  %v1493_v25 = vmul.f32 2.0, %v2702_v14  ;;  %v1690_v17 = vmul.f32 %v1646_v15, %v3523_v20 }
  0xe4   : > { %2711 = vrcp.f32 %v1580_v16  ;;  %v1450_v28 = vmul.f32 %v2704_v21, %v2704_v21  ;;  %v1494_v30 = vmul.f32 2.0, %v2704_v21 }
  0xe5   : > { %2713 = vtanh.f32 %v1689_v22  ;;  %v1537_v31 = vadd.f32 %v1493_v25, %v1449_v23 }
  0xe6   : > { %v3553_v32 = vpop.f32.mrf.mxu2  ;;  %2715 = vtanh.f32 %v1690_v17  ;;  %v1538_v33 = vadd.f32 %v1494_v30, %v1450_v28  ;;  %v3558_v18 = vpop.f32.mrf.mxu0 }
  0xe7   : > { %v1299_v34 = vmin.f32 %v3553_v32, 20.0  ;;  %v2706_v36 = vpop.eup %2705  ;;  %v1581_v37 = vadd.f32 2.0, %v1537_v31  ;;  %2717 = vpow2.f32 %v1345_v13  ;;  %v3561_v42 = vpop.f32.mrf.mxu1  ;;  %v1319_v47 = vmin.f32 %v3558_v18, 20.0 }
  0xe8   : > { %v3556_v35 = vpop.f32.mrf.mxu3  ;;  %v2708_v38 = vpop.eup %2707  ;;  %v1647_v39 = vmul.f32 %v2706_v36, %v1515_v59  ;;  %v1582_v40 = vadd.f32 2.0, %v1538_v33  ;;  %2719 = vpow2.f32 %v1347_v19  ;;  %v1320_v54 = vmin.f32 %v3561_v42, 20.0 }
  0xe9   : > { %v1300_v20 = vmin.f32 %v3556_v35, 20.0  ;;  %v1349_v41 = vmul.f32 1.442695, %v1299_v34  ;;  %v2710_v44 = vpop.eup %2709  ;;  %v1648_v45 = vmul.f32 %v2708_v38, %v1516_v62  ;;  %2721 = vrcp.f32 %v1581_v37 }
  0xea   : > { %v2712_v48 = vpop.eup %2711  ;;  %v1691_v49 = vmul.f32 %v1647_v39, %v3526_v24  ;;  %v1667_v50 = vmul.f32 %v2710_v44, %v1535_v3  ;;  %2723 = vrcp.f32 %v1582_v40  ;;  %v1389_v58 = vmul.f32 1.442695, %v1319_v47 }
  0xeb   : > { %v2714_v51 = vpop.eup %2713  ;;  %v1692_v52 = vmul.f32 %v1648_v45, %v3529_v26  ;;  %v1668_v53 = vmul.f32 %v2712_v48, %v1536_v8  ;;  %2725 = vpow2.f32 %v1349_v41  ;;  %v1351_v24 = vmul.f32 1.442695, %v1300_v20 }
  0xec   : > { %v2716_v55 = vpop.eup %2715  ;;  %1777 = vst [vmem:[%s3569_s20] sm:$0xff] %v2714_v51  ;;  %2727 = vtanh.f32 %v1691_v49  ;;  %v1711_v56 = vmul.f32 %v1667_v50, %v3531_v27  ;;  %v1391_v27 = vmul.f32 1.442695, %v1320_v54 }
  0xed   : > { %v2718_v57 = vpop.eup %2717  ;;  %1778 = vst [vmem:[%s3569_s20 + $0x8] sm:$0xff] %v2716_v55  ;;  %2729 = vtanh.f32 %v1692_v52  ;;  %v1712_v26 = vmul.f32 %v1668_v53, %v3535_v29 }
  0xee   : > { %v3575_v59 = vpop.f32.mrf.mxu2  ;;  %v2720_v60 = vpop.eup %2719  ;;  %2731 = vtanh.f32 %v1711_v56  ;;  %v1429_v61 = vmul.f32 %v2718_v57, %v2718_v57  ;;  %v1473_v62 = vmul.f32 2.0, %v2718_v57 }
  0xef   : > { %v2722_v0 = vpop.eup %2721  ;;  %2733 = vtanh.f32 %v1712_v26  ;;  %v1430_v2 = vmul.f32 %v2720_v60, %v2720_v60  ;;  %v1474_v3 = vmul.f32 2.0, %v2720_v60  ;;  %v1321_v29 = vmin.f32 %v3575_v59, 20.0 }
  0xf0   : > { %v3577_v63 = vpop.f32.mrf.mxu3  ;;  %v2724_v4 = vpop.eup %2723  ;;  %v1669_v6 = vmul.f32 %v2722_v0, %v1537_v31  ;;  %v3579_v7 = vadd.f32 %v1473_v62, %v1429_v61  ;;  %2735 = vpow2.f32 %v1351_v24 }
  0xf1   : > { %v2726_v8 = vpop.eup %2725  ;;  %v1670_v9 = vmul.f32 %v2724_v4, %v1538_v33  ;;  %v3582_v10 = vadd.f32 %v1474_v3, %v1430_v2  ;;  %2737 = vpow2.f32 %v1389_v58  ;;  %v1322_v11 = vmin.f32 %v3577_v63, 20.0 }
  0xf2   : > { %v2728_v12 = vpop.eup %2727  ;;  %v1713_v13 = vmul.f32 %v1669_v6, %v3538_v43  ;;  %v1561_v14 = vadd.f32 2.0, %v3579_v7  ;;  %v1431_v15 = vmul.f32 %v2726_v8, %v2726_v8  ;;  %v1475_v16 = vmul.f32 2.0, %v2726_v8 }
  0xf3   : > { %v2730_v19 = vpop.eup %2729  ;;  %1779 = vst [vmem:[%s3569_s20 + $0x10] sm:$0xff] %v2728_v12  ;;  %v1714_v21 = vmul.f32 %v1670_v9, %v3541_v46  ;;  %v1562_v22 = vadd.f32 2.0, %v3582_v10  ;;  %2739 = vpow2.f32 %v1391_v27  ;;  %v1393_v43 = vmul.f32 1.442695, %v1321_v29 }
  0xf4   : > { %v2732_v23 = vpop.eup %2731  ;;  %1780 = vst [vmem:[%s3569_s20 + $0x18] sm:$0xff] %v2730_v19  ;;  %2741 = vtanh.f32 %v1713_v13  ;;  %v1519_v25 = vadd.f32 %v1475_v16, %v1431_v15  ;;  %v1395_v34 = vmul.f32 1.442695, %v1322_v11 }
  0xf5   : > { %v2734_v28 = vpop.eup %2733  ;;  %1799 = vst [vmem:[%s3569_s20 + $0xb0] sm:$0xff] %v2732_v23  ;;  %2743 = vtanh.f32 %v1714_v21 }
  0xf6   : > { %v3591_v17 = vpop.f32.mrf.mxu0  ;;  %v2736_v33 = vpop.eup %2735  ;;  %1800 = vst [vmem:[%s3569_s20 + $0xb8] sm:$0xff] %v2734_v28  ;;  %2745 = vrcp.f32 %v1561_v14  ;;  %v1563_v46 = vadd.f32 2.0, %v1519_v25 }
  0xf7   : > { %v1301_v30 = vmin.f32 %v3591_v17, 20.0  ;;  %v3595_v31 = vpop.f32.mrf.mxu1  ;;  %v2738_v37 = vpop.eup %2737  ;;  %2747 = vrcp.f32 %v1562_v22  ;;  %v1432_v20 = vmul.f32 %v2736_v33, %v2736_v33  ;;  %v1476_v38 = vmul.f32 2.0, %v2736_v33 }
  0xf8   : > { %v1302_v36 = vmin.f32 %v3595_v31, 20.0  ;;  %2749 = vrcp.f32 %v1563_v46  ;;  %v1451_v40 = vmul.f32 %v2738_v37, %v2738_v37  ;;  %v1495_v41 = vmul.f32 2.0, %v2738_v37 }
  0xf9   : > { %v1353_v39 = vmul.f32 1.442695, %v1301_v30  ;;  %v2740_v45 = vpop.eup %2739  ;;  %v1520_v47 = vadd.f32 %v1476_v38, %v1432_v20  ;;  %2751 = vpow2.f32 %v1393_v43 }
  0xfa   : > { %v1355_v44 = vmul.f32 1.442695, %v1302_v36  ;;  %v2742_v48 = vpop.eup %2741  ;;  %v1539_v49 = vadd.f32 %v1495_v41, %v1451_v40  ;;  %v1452_v50 = vmul.f32 %v2740_v45, %v2740_v45  ;;  %v1496_v51 = vmul.f32 2.0, %v2740_v45 }
  0xfb   : > { %2753 = vpow2.f32 %v1395_v34  ;;  %v2744_v52 = vpop.eup %2743  ;;  %1801 = vst [vmem:[%s3569_s20 + $0xc0] sm:$0xff] %v2742_v48  ;;  %v1564_v53 = vadd.f32 2.0, %v1520_v47 }
  0xfc   : > { %2755 = vpow2.f32 %v1353_v39  ;;  %v2746_v55 = vpop.eup %2745  ;;  %1802 = vst [vmem:[%s3569_s20 + $0xc8] sm:$0xff] %v2744_v52  ;;  %v1583_v56 = vadd.f32 2.0, %v1539_v49  ;;  %v1540_v24 = vadd.f32 %v1496_v51, %v1452_v50 }
  0xfd   : > { %2757 = vpow2.f32 %v1355_v44  ;;  %v2748_v60 = vpop.eup %2747  ;;  %v1649_v61 = vmul.f32 %v2746_v55, %v3579_v7 }
  0xfe   : > { %v3600_v54 = vpop.f32.mrf.mxu2  ;;  %v3606_v58 = vpop.f32.mrf.mxu0  ;;  %2759 = vrcp.f32 %v1564_v53  ;;  %v1650_v2 = vmul.f32 %v2748_v60, %v3582_v10  ;;  %v1584_v3 = vadd.f32 2.0, %v1540_v24 }
  0xff   : > { %v1303_v57 = vmin.f32 %v3600_v54, 20.0  ;;  %v2750_v0 = vpop.eup %2749  ;;  %2761 = vrcp.f32 %v1583_v56  ;;  %v1323_v27 = vmin.f32 %v3606_v58, 20.0  ;;  %v1693_v6 = vmul.f32 %v1649_v61, %v3544_v1 }
 0x100   : > { %v3604_v26 = vpop.f32.mrf.mxu3  ;;  %v2752_v4 = vpop.eup %2751  ;;  %v1651_v29 = vmul.f32 %v2750_v0, %v1519_v25  ;;  %v1694_v12 = vmul.f32 %v1650_v2, %v3547_v5  ;;  %2763 = vrcp.f32 %v1584_v3 }
 0x101   : > { %v1304_v62 = vmin.f32 %v3604_v26, 20.0  ;;  %v1357_v8 = vmul.f32 1.442695, %v1303_v57  ;;  %v2754_v11 = vpop.eup %2753  ;;  %v1453_v7 = vmul.f32 %v2752_v4, %v2752_v4  ;;  %v1497_v13 = vmul.f32 2.0, %v2752_v4  ;;  %v3615_v5 = vpop.f32.mrf.mxu1 }
 0x102   : > { %v2756_v14 = vpop.eup %2755  ;;  %2765 = vtanh.f32 %v1693_v6  ;;  %v1695_v10 = vmul.f32 %v1651_v29, %v3553_v32  ;;  %v1454_v15 = vmul.f32 %v2754_v11, %v2754_v11  ;;  %v1498_v16 = vmul.f32 2.0, %v2754_v11 }
 0x103   : > { %v1359_v9 = vmul.f32 1.442695, %v1304_v62  ;;  %v2758_v19 = vpop.eup %2757  ;;  %2767 = vtanh.f32 %v1694_v12  ;;  %v1541_v21 = vadd.f32 %v1497_v13, %v1453_v7  ;;  %v1433_v22 = vmul.f32 %v2756_v14, %v2756_v14 }
 0x104   : > { %v1477_v1 = vmul.f32 2.0, %v2756_v14  ;;  %v2760_v23 = vpop.eup %2759  ;;  %2769 = vtanh.f32 %v1695_v10  ;;  %v1542_v25 = vadd.f32 %v1498_v16, %v1454_v15  ;;  %v1434_v28 = vmul.f32 %v2758_v19, %v2758_v19 }
 0x105   : > { %v1478_v43 = vmul.f32 2.0, %v2758_v19  ;;  %v2762_v30 = vpop.eup %2761  ;;  %v1652_v33 = vmul.f32 %v2760_v23, %v1520_v47  ;;  %v1585_v46 = vadd.f32 2.0, %v1541_v21  ;;  %2771 = vpow2.f32 %v1357_v8 }
 0x106   : > { %v3617_v34 = vadd.f32 %v1477_v1, %v1433_v22  ;;  %v1671_v32 = vmul.f32 %v2762_v30, %v1539_v49  ;;  %v1586_v36 = vadd.f32 2.0, %v1542_v25  ;;  %2773 = vpow2.f32 %v1359_v9  ;;  %v3621_v20 = vpop.f32.mrf.mxu2  ;;  %v2764_v39 = vpop.eup %2763 }
 0x107   : > { %v3619_v37 = vadd.f32 %v1478_v43, %v1434_v28  ;;  %v1696_v40 = vmul.f32 %v1652_v33, %v3556_v35  ;;  %2775 = vrcp.f32 %v1585_v46  ;;  %v1324_v44 = vmin.f32 %v3615_v5, 20.0 }
 0x108   : > { %v3623_v38 = vpop.f32.mrf.mxu3  ;;  %v1565_v41 = vadd.f32 2.0, %v3617_v34  ;;  %v2766_v45 = vpop.eup %2765  ;;  %v1715_v47 = vmul.f32 %v1671_v32, %v3558_v18  ;;  %v1672_v48 = vmul.f32 %v2764_v39, %v1540_v24  ;;  %2777 = vrcp.f32 %v1586_v36 }
 0x109   : > { %v2768_v49 = vpop.eup %2767  ;;  %1781 = vst [vmem:[%s3569_s20 + $0x20] sm:$0xff] %v2766_v45  ;;  %2779 = vtanh.f32 %v1696_v40  ;;  %v1566_v50 = vadd.f32 2.0, %v3619_v37  ;;  %v1325_v51 = vmin.f32 %v3621_v20, 20.0  ;;  %v1326_v35 = vmin.f32 %v3623_v38, 20.0 }
 0x10a   : > { %v2770_v52 = vpop.eup %2769  ;;  %1782 = vst [vmem:[%s3569_s20 + $0x28] sm:$0xff] %v2768_v49  ;;  %2781 = vtanh.f32 %v1715_v47  ;;  %v1716_v53 = vmul.f32 %v1672_v48, %v3561_v42  ;;  %v1397_v55 = vmul.f32 1.442695, %v1323_v27  ;;  %v1399_v18 = vmul.f32 1.442695, %v1324_v44 }
 0x10b   : > { %v2772_v56 = vpop.eup %2771  ;;  %1783 = vst [vmem:[%s3569_s20 + $0x30] sm:$0xff] %v2770_v52  ;;  %2783 = vrcp.f32 %v1565_v41  ;;  %v1401_v62 = vmul.f32 1.442695, %v1325_v51  ;;  %v1403_v42 = vmul.f32 1.442695, %v1326_v35 }
 0x10c   : > { %v2774_v57 = vpop.eup %2773  ;;  %2785 = vtanh.f32 %v1716_v53  ;;  %v1435_v60 = vmul.f32 %v2772_v56, %v2772_v56  ;;  %v1479_v61 = vmul.f32 2.0, %v2772_v56 }
 0x10d   : > { %v2776_v2 = vpop.eup %2775  ;;  %2787 = vrcp.f32 %v1566_v50  ;;  %v1436_v3 = vmul.f32 %v2774_v57, %v2774_v57  ;;  %v1480_v4 = vmul.f32 2.0, %v2774_v57 }
 0x10e   : > { %v3636_v24 = vpop.f32.mrf.mxu0  ;;  %v2778_v27 = vpop.eup %2777  ;;  %v1673_v6 = vmul.f32 %v2776_v2, %v1541_v21  ;;  %v3640_v29 = vadd.f32 %v1479_v61, %v1435_v60  ;;  %2789 = vpow2.f32 %v1397_v55 }
 0x10f   : > { %v3638_v0 = vpop.f32.mrf.mxu1  ;;  %v1305_v8 = vmin.f32 %v3636_v24, 20.0  ;;  %v2780_v9 = vpop.eup %2779  ;;  %v1674_v11 = vmul.f32 %v2778_v27, %v1542_v25  ;;  %v3643_v12 = vadd.f32 %v1480_v4, %v1436_v3  ;;  %2791 = vpow2.f32 %v1399_v18 }
 0x110   : > { %v1306_v7 = vmin.f32 %v3638_v0, 20.0  ;;  %v2782_v13 = vpop.eup %2781  ;;  %1784 = vst [vmem:[%s3569_s20 + $0x38] sm:$0xff] %v2780_v9  ;;  %v1717_v14 = vmul.f32 %v1673_v6, %v3575_v59  ;;  %v1567_v10 = vadd.f32 2.0, %v3640_v29  ;;  %2793 = vpow2.f32 %v1401_v62 }
 0x111   : > { %v2784_v15 = vpop.eup %2783  ;;  %1803 = vst [vmem:[%s3569_s20 + $0xd0] sm:$0xff] %v2782_v13  ;;  %v1718_v16 = vmul.f32 %v1674_v11, %v3577_v63  ;;  %v1568_v19 = vadd.f32 2.0, %v3643_v12  ;;  %2795 = vpow2.f32 %v1403_v42  ;;  %v1361_v59 = vmul.f32 1.442695, %v1305_v8 }
 0x112   : > { %v2786_v21 = vpop.eup %2785  ;;  %2797 = vtanh.f32 %v1717_v14  ;;  %v1653_v22 = vmul.f32 %v2784_v15, %v3617_v34  ;;  %v1363_v25 = vmul.f32 1.442695, %v1306_v7 }
 0x113   : > { %v2788_v23 = vpop.eup %2787  ;;  %1804 = vst [vmem:[%s3569_s20 + $0xd8] sm:$0xff] %v2786_v21  ;;  %2799 = vtanh.f32 %v1718_v16 }
 0x114   : > { %v2790_v30 = vpop.eup %2789  ;;  %v1697_v63 = vmul.f32 %v1653_v22, %v3591_v17  ;;  %v1654_v33 = vmul.f32 %v2788_v23, %v3619_v37  ;;  %2801 = vrcp.f32 %v1567_v10 }
 0x115   : > { %v2792_v34 = vpop.eup %2791  ;;  %2803 = vrcp.f32 %v1568_v19  ;;  %v1455_v32 = vmul.f32 %v2790_v30, %v2790_v30  ;;  %v1499_v36 = vmul.f32 2.0, %v2790_v30 }
 0x116   : > { %v3653_v1 = vpop.f32.mrf.mxu2  ;;  %v2794_v40 = vpop.eup %2793  ;;  %2805 = vtanh.f32 %v1697_v63  ;;  %v1698_v41 = vmul.f32 %v1654_v33, %v3595_v31  ;;  %v1456_v44 = vmul.f32 %v2792_v34, %v2792_v34  ;;  %v1500_v45 = vmul.f32 2.0, %v2792_v34 }
 0x117   : > { %v1307_v28 = vmin.f32 %v3653_v1, 20.0  ;;  %v2796_v47 = vpop.eup %2795  ;;  %v1543_v48 = vadd.f32 %v1499_v36, %v1455_v32  ;;  %v1457_v17 = vmul.f32 %v2794_v40, %v2794_v40  ;;  %v1501_v37 = vmul.f32 2.0, %v2794_v40  ;;  %v3663_v49 = vpop.f32.mrf.mxu0 }
 0x118   : > { %v3657_v43 = vpop.f32.mrf.mxu3  ;;  %2807 = vpow2.f32 %v1361_v59  ;;  %v2798_v50 = vpop.eup %2797  ;;  %v1544_v51 = vadd.f32 %v1500_v45, %v1456_v44  ;;  %v1458_v35 = vmul.f32 %v2796_v47, %v2796_v47  ;;  %v1502_v52 = vmul.f32 2.0, %v2796_v47 }
 0x119   : > { %v1308_v46 = vmin.f32 %v3657_v43, 20.0  ;;  %v1365_v39 = vmul.f32 1.442695, %v1307_v28  ;;  %2809 = vtanh.f32 %v1698_v41  ;;  %v3665_v53 = vpop.f32.mrf.mxu1  ;;  %v2800_v55 = vpop.eup %2799  ;;  %1805 = vst [vmem:[%s3569_s20 + $0xe0] sm:$0xff] %v2798_v50  ;;  %v1587_v31 = vadd.f32 2.0, %v1543_v48 }
 0x11a   : > { %v1545_v56 = vadd.f32 %v1501_v37, %v1457_v17  ;;  %2811 = vpow2.f32 %v1363_v25  ;;  %v2802_v18 = vpop.eup %2801  ;;  %1806 = vst [vmem:[%s3569_s20 + $0xe8] sm:$0xff] %v2800_v55  ;;  %v1588_v57 = vadd.f32 2.0, %v1544_v51  ;;  %v1546_v60 = vadd.f32 %v1502_v52, %v1458_v35 }
 0x11b   : > { %2813 = vpow2.f32 %v1365_v39  ;;  %v1327_v61 = vmin.f32 %v3663_v49, 20.0  ;;  %v2804_v2 = vpop.eup %2803  ;;  %v1655_v3 = vmul.f32 %v2802_v18, %v3640_v29  ;;  %v1328_v42 = vmin.f32 %v3665_v53, 20.0 }
 0x11c   : > { %2815 = vrcp.f32 %v1587_v31  ;;  %v1589_v4 = vadd.f32 2.0, %v1545_v56  ;;  %v2806_v27 = vpop.eup %2805  ;;  %v1656_v6 = vmul.f32 %v2804_v2, %v3643_v12  ;;  %v1590_v8 = vadd.f32 2.0, %v1546_v60 }
 0x11d   : > { %2817 = vrcp.f32 %v1588_v57  ;;  %v1367_v9 = vmul.f32 1.442695, %v1308_v46  ;;  %1785 = vst [vmem:[%s3569_s20 + $0x40] sm:$0xff] %v2806_v27  ;;  %v1699_v7 = vmul.f32 %v1655_v3, %v3600_v54  ;;  %v1405_v13 = vmul.f32 1.442695, %v1327_v61 }
 0x11e   : > { %v3670_v62 = vpop.f32.mrf.mxu2  ;;  %v2808_v11 = vpop.eup %2807  ;;  %2819 = vrcp.f32 %v1589_v4  ;;  %v1700_v10 = vmul.f32 %v1656_v6, %v3604_v26  ;;  %v1407_v12 = vmul.f32 1.442695, %v1328_v42 }
 0x11f   : > { %v1329_v14 = vmin.f32 %v3670_v62, 20.0  ;;  %v2810_v29 = vpop.eup %2809  ;;  %2821 = vrcp.f32 %v1590_v8  ;;  %v1437_v15 = vmul.f32 %v2808_v11, %v2808_v11  ;;  %v1481_v16 = vmul.f32 2.0, %v2808_v11 }
 0x120   : > { %v2812_v19 = vpop.eup %2811  ;;  %1786 = vst [vmem:[%s3569_s20 + $0x48] sm:$0xff] %v2810_v29  ;;  %2823 = vtanh.f32 %v1699_v7  ;;  %v3680_v63 = vpop.f32.mrf.mxu3 }
 0x121   : > { %v2814_v21 = vpop.eup %2813  ;;  %2825 = vtanh.f32 %v1700_v10  ;;  %v1525_v22 = vadd.f32 %v1481_v16, %v1437_v15  ;;  %v1438_v23 = vmul.f32 %v2812_v19, %v2812_v19  ;;  %v1482_v59 = vmul.f32 2.0, %v2812_v19 }
 0x122   : > { %v2816_v54 = vpop.eup %2815  ;;  %v1439_v25 = vmul.f32 %v2814_v21, %v2814_v21  ;;  %v1483_v28 = vmul.f32 2.0, %v2814_v21  ;;  %2827 = vpow2.f32 %v1367_v9  ;;  %v1409_v30 = vmul.f32 1.442695, %v1329_v14 }
 0x123   : > { %v2818_v26 = vpop.eup %2817  ;;  %v1675_v33 = vmul.f32 %v2816_v54, %v1543_v48  ;;  %v1569_v46 = vadd.f32 2.0, %v1525_v22  ;;  %v3682_v34 = vadd.f32 %v1482_v59, %v1438_v23  ;;  %2829 = vpow2.f32 %v1405_v13 }
 0x124   : > { %v2820_v32 = vpop.eup %2819  ;;  %v1676_v36 = vmul.f32 %v2818_v26, %v1544_v51  ;;  %v3684_v39 = vadd.f32 %v1483_v28, %v1439_v25  ;;  %2831 = vpow2.f32 %v1407_v12  ;;  %v1330_v45 = vmin.f32 %v3680_v63, 20.0 }
 0x125   : > { %v2822_v40 = vpop.eup %2821  ;;  %v1719_v41 = vmul.f32 %v1675_v33, %v3606_v58  ;;  %v1677_v44 = vmul.f32 %v2820_v32, %v1545_v56  ;;  %2833 = vrcp.f32 %v1569_v46  ;;  %v1570_v35 = vadd.f32 2.0, %v3682_v34 }
 0x126   : > { %v2824_v47 = vpop.eup %2823  ;;  %v1720_v48 = vmul.f32 %v1676_v36, %v3615_v5  ;;  %v1678_v17 = vmul.f32 %v2822_v40, %v1546_v60  ;;  %2835 = vpow2.f32 %v1409_v30  ;;  %v3689_v37 = vpop.f32.mrf.mxu0  ;;  %v1571_v5 = vadd.f32 2.0, %v3684_v39 }
 0x127   : > { %v2826_v50 = vpop.eup %2825  ;;  %1787 = vst [vmem:[%s3569_s20 + $0x50] sm:$0xff] %v2824_v47  ;;  %2837 = vtanh.f32 %v1719_v41  ;;  %v1721_v51 = vmul.f32 %v1677_v44, %v3621_v20  ;;  %v3694_v58 = vpop.f32.mrf.mxu1  ;;  %v1411_v57 = vmul.f32 1.442695, %v1330_v45  ;;  %v1309_v2 = vmin.f32 %v3689_v37, 20.0 }
 0x128   : > { %v2828_v52 = vpop.eup %2827  ;;  %1788 = vst [vmem:[%s3569_s20 + $0x58] sm:$0xff] %v2826_v50  ;;  %2839 = vtanh.f32 %v1720_v48  ;;  %v1722_v55 = vmul.f32 %v1678_v17, %v3623_v38  ;;  %v1310_v11 = vmin.f32 %v3694_v58, 20.0 }
 0x129   : > { %v2830_v31 = vpop.eup %2829  ;;  %2841 = vtanh.f32 %v1721_v51  ;;  %v1440_v56 = vmul.f32 %v2828_v52, %v2828_v52  ;;  %v1484_v18 = vmul.f32 2.0, %v2828_v52  ;;  %v1369_v25 = vmul.f32 1.442695, %v1309_v2 }
 0x12a   : > { %v2832_v60 = vpop.eup %2831  ;;  %2843 = vtanh.f32 %v1722_v55  ;;  %v1459_v61 = vmul.f32 %v2830_v31, %v2830_v31  ;;  %v1503_v20 = vmul.f32 2.0, %v2830_v31  ;;  %v1371_v33 = vmul.f32 1.442695, %v1310_v11 }
 0x12b   : > { %v2834_v3 = vpop.eup %2833  ;;  %2845 = vrcp.f32 %v1570_v35  ;;  %v1528_v4 = vadd.f32 %v1484_v18, %v1440_v56  ;;  %v1460_v42 = vmul.f32 %v2832_v60, %v2832_v60  ;;  %v1504_v27 = vmul.f32 2.0, %v2832_v60 }
 0x12c   : > { %v2836_v6 = vpop.eup %2835  ;;  %v1657_v8 = vmul.f32 %v2834_v3, %v1525_v22  ;;  %2847 = vrcp.f32 %v1571_v5  ;;  %v1547_v9 = vadd.f32 %v1503_v20, %v1459_v61 }
 0x12d   : > { %v2838_v7 = vpop.eup %2837  ;;  %v1572_v13 = vadd.f32 2.0, %v1528_v4  ;;  %v1548_v14 = vadd.f32 %v1504_v27, %v1460_v42  ;;  %v1461_v29 = vmul.f32 %v2836_v6, %v2836_v6  ;;  %v1505_v10 = vmul.f32 2.0, %v2836_v6 }
 0x12e   : > { %v3700_v38 = vpop.f32.mrf.mxu2  ;;  %v2840_v16 = vpop.eup %2839  ;;  %1807 = vst [vmem:[%s3569_s20 + $0xf0] sm:$0xff] %v2838_v7  ;;  %v1701_v19 = vmul.f32 %v1657_v8, %v3636_v24  ;;  %v1591_v12 = vadd.f32 2.0, %v1547_v9  ;;  %2849 = vpow2.f32 %v1411_v57 }
 0x12f   : > { %v3703_v15 = vpop.f32.mrf.mxu3  ;;  %v2842_v21 = vpop.eup %2841  ;;  %1808 = vst [vmem:[%s3569_s20 + $0xf8] sm:$0xff] %v2840_v16  ;;  %2851 = vrcp.f32 %v1572_v13  ;;  %v1592_v22 = vadd.f32 2.0, %v1548_v14  ;;  %v1549_v23 = vadd.f32 %v1505_v10, %v1461_v29  ;;  %v1311_v59 = vmin.f32 %v3700_v38, 20.0 }
 0x130   : > { %v2844_v54 = vpop.eup %2843  ;;  %1809 = vst [vmem:[%s3569_s20 + $0x100] sm:$0xff] %v2842_v21  ;;  %2853 = vtanh.f32 %v1701_v19  ;;  %v1312_v28 = vmin.f32 %v3703_v15, 20.0  ;;  %v3711_v30 = vpop.f32.mrf.mxu0 }
 0x131   : > { %v2846_v26 = vpop.eup %2845  ;;  %1810 = vst [vmem:[%s3569_s20 + $0x108] sm:$0xff] %v2844_v54  ;;  %2855 = vrcp.f32 %v1591_v12  ;;  %v1593_v24 = vadd.f32 2.0, %v1549_v23  ;;  %v3714_v46 = vpop.f32.mrf.mxu1  ;;  %v1373_v41 = vmul.f32 1.442695, %v1311_v59  ;;  %v1331_v44 = vmin.f32 %v3711_v30, 20.0 }
 0x132   : > { %v2848_v32 = vpop.eup %2847  ;;  %v1658_v36 = vmul.f32 %v2846_v26, %v3682_v34  ;;  %2857 = vrcp.f32 %v1592_v22  ;;  %v1375_v48 = vmul.f32 1.442695, %v1312_v28  ;;  %v1332_v17 = vmin.f32 %v3714_v46, 20.0 }
 0x133   : > { %v1659_v40 = vmul.f32 %v2848_v32, %v3684_v39  ;;  %2859 = vrcp.f32 %v1593_v24 }
 0x134   : > { %v2850_v45 = vpop.eup %2849  ;;  %v1702_v47 = vmul.f32 %v1658_v36, %v3638_v0  ;;  %2861 = vpow2.f32 %v1369_v25  ;;  %v1413_v0 = vmul.f32 1.442695, %v1331_v44  ;;  %v1415_v3 = vmul.f32 1.442695, %v1332_v17 }
 0x135   : > { %v2852_v50 = vpop.eup %2851  ;;  %v1703_v51 = vmul.f32 %v1659_v40, %v3653_v1  ;;  %v1462_v35 = vmul.f32 %v2850_v45, %v2850_v45  ;;  %v1506_v34 = vmul.f32 2.0, %v2850_v45  ;;  %2863 = vpow2.f32 %v1371_v33 }
 0x136   : > { %v3722_v52 = vpop.f32.mrf.mxu2  ;;  %v2854_v39 = vpop.eup %2853  ;;  %2865 = vtanh.f32 %v1702_v47  ;;  %v1660_v55 = vmul.f32 %v2852_v50, %v1528_v4 }
 0x137   : > { %v2856_v5 = vpop.eup %2855  ;;  %1789 = vst [vmem:[%s3569_s20 + $0x60] sm:$0xff] %v2854_v39  ;;  %2867 = vtanh.f32 %v1703_v51  ;;  %v1550_v31 = vadd.f32 %v1506_v34, %v1462_v35  ;;  %v3725_v56 = vpop.f32.mrf.mxu3  ;;  %v1333_v1 = vmin.f32 %v3722_v52, 20.0 }
 0x138   : > { %v2858_v18 = vpop.eup %2857  ;;  %v1704_v57 = vmul.f32 %v1660_v55, %v3657_v43  ;;  %v1679_v60 = vmul.f32 %v2856_v5, %v1547_v9  ;;  %2869 = vpow2.f32 %v1373_v41  ;;  %v1334_v6 = vmin.f32 %v3725_v56, 20.0 }
 0x139   : > { %v2860_v61 = vpop.eup %2859  ;;  %v1680_v20 = vmul.f32 %v2858_v18, %v1548_v14  ;;  %v1594_v2 = vadd.f32 2.0, %v1550_v31  ;;  %2871 = vpow2.f32 %v1375_v48  ;;  %v1417_v19 = vmul.f32 1.442695, %v1333_v1 }
 0x13a   : > { %v2862_v4 = vpop.eup %2861  ;;  %2873 = vtanh.f32 %v1704_v57  ;;  %v1723_v42 = vmul.f32 %v1679_v60, %v3663_v49  ;;  %v1681_v27 = vmul.f32 %v2860_v61, %v1549_v23  ;;  %v1419_v21 = vmul.f32 1.442695, %v1334_v6 }
 0x13b   : > { %v2864_v8 = vpop.eup %2863  ;;  %v1724_v43 = vmul.f32 %v1680_v20, %v3665_v53  ;;  %2875 = vrcp.f32 %v1594_v2  ;;  %v1441_v9 = vmul.f32 %v2862_v4, %v2862_v4  ;;  %v1485_v11 = vmul.f32 2.0, %v2862_v4 }
 0x13c   : > { %v2866_v13 = vpop.eup %2865  ;;  %2877 = vtanh.f32 %v1723_v42  ;;  %v1725_v14 = vmul.f32 %v1681_v27, %v3670_v62  ;;  %v1442_v29 = vmul.f32 %v2864_v8, %v2864_v8  ;;  %v1486_v10 = vmul.f32 2.0, %v2864_v8 }
 0x13d   : > { %v2868_v16 = vpop.eup %2867  ;;  %1790 = vst [vmem:[%s3569_s20 + $0x68] sm:$0xff] %v2866_v13  ;;  %2879 = vtanh.f32 %v1724_v43  ;;  %v1529_v49 = vadd.f32 %v1485_v11, %v1441_v9 }
 0x13e   : > { %v3732_v7 = vpop.f32.mrf.mxu0  ;;  %v2870_v12 = vpop.eup %2869  ;;  %1791 = vst [vmem:[%s3569_s20 + $0x70] sm:$0xff] %v2868_v16  ;;  %2881 = vtanh.f32 %v1725_v14  ;;  %v1530_v53 = vadd.f32 %v1486_v10, %v1442_v29 }
 0x13f   : > { %v1313_v22 = vmin.f32 %v3732_v7, 20.0  ;;  %v3738_v23 = vpop.f32.mrf.mxu1  ;;  %v2872_v59 = vpop.eup %2871  ;;  %v1573_v54 = vadd.f32 2.0, %v1529_v49  ;;  %v1443_v62 = vmul.f32 %v2870_v12, %v2870_v12  ;;  %v1487_v25 = vmul.f32 2.0, %v2870_v12 }
 0x140   : > { %2883 = vpow2.f32 %v1413_v0  ;;  %v2874_v28 = vpop.eup %2873  ;;  %v1574_v26 = vadd.f32 2.0, %v1530_v53  ;;  %v1444_v24 = vmul.f32 %v2872_v59, %v2872_v59  ;;  %v1488_v33 = vmul.f32 2.0, %v2872_v59 }
 0x141   : > { %2885 = vpow2.f32 %v1415_v3  ;;  %v2876_v32 = vpop.eup %2875  ;;  %1792 = vst [vmem:[%s3569_s20 + $0x78] sm:$0xff] %v2874_v28  ;;  %v1531_v36 = vadd.f32 %v1487_v25, %v1443_v62  ;;  %v1314_v40 = vmin.f32 %v3738_v23, 20.0  ;;  %v1377_v35 = vmul.f32 1.442695, %v1313_v22 }
 0x142   : > { %2887 = vrcp.f32 %v1573_v54  ;;  %v2878_v41 = vpop.eup %2877  ;;  %v1682_v44 = vmul.f32 %v2876_v32, %v1550_v31  ;;  %v1532_v45 = vadd.f32 %v1488_v33, %v1444_v24 }
 0x143   : > { %2889 = vrcp.f32 %v1574_v26  ;;  %v2880_v47 = vpop.eup %2879  ;;  %1811 = vst [vmem:[%s3569_s20 + $0x110] sm:$0xff] %v2878_v41  ;;  %v1575_v48 = vadd.f32 2.0, %v1531_v36  ;;  %v1379_v39 = vmul.f32 1.442695, %v1314_v40 }
 0x144   : > { %2891 = vpow2.f32 %v1417_v19  ;;  %v2882_v17 = vpop.eup %2881  ;;  %1812 = vst [vmem:[%s3569_s20 + $0x118] sm:$0xff] %v2880_v47  ;;  %v1726_v50 = vmul.f32 %v1682_v44, %v3680_v63  ;;  %v1576_v51 = vadd.f32 2.0, %v1532_v45 }
 0x145   : > { %2893 = vpow2.f32 %v1419_v21  ;;  %1813 = vst [vmem:[%s3569_s20 + $0x120] sm:$0xff] %v2882_v17 }
 0x146   : > { %v2884_v34 = vpop.eup %2883  ;;  %2895 = vrcp.f32 %v1575_v48  ;;  %v3746_v0 = vpop.f32.mrf.mxu0 }
 0x147   : > { %v2886_v55 = vpop.eup %2885  ;;  %2897 = vtanh.f32 %v1726_v50  ;;  %v1463_v5 = vmul.f32 %v2884_v34, %v2884_v34  ;;  %v1507_v31 = vmul.f32 2.0, %v2884_v34  ;;  %v1335_v4 = vmin.f32 %v3746_v0, 20.0  ;;  %v3750_v9 = vpop.f32.mrf.mxu1 }
 0x148   : > { %v2888_v18 = vpop.eup %2887  ;;  %2899 = vrcp.f32 %v1576_v51  ;;  %v1464_v57 = vmul.f32 %v2886_v55, %v2886_v55  ;;  %v1508_v60 = vmul.f32 2.0, %v2886_v55  ;;  %v1336_v21 = vmin.f32 %v3750_v9, 20.0 }
 0x149   : > { %v2890_v1 = vpop.eup %2889  ;;  %v1661_v61 = vmul.f32 %v2888_v18, %v1529_v49  ;;  %v1551_v63 = vadd.f32 %v1507_v31, %v1463_v5  ;;  %2901 = vpow2.f32 %v1377_v35 }
 0x14a   : > { %v2892_v20 = vpop.eup %2891  ;;  %v1662_v2 = vmul.f32 %v2890_v1, %v1530_v53  ;;  %v1552_v3 = vadd.f32 %v1508_v60, %v1464_v57  ;;  %2903 = vpow2.f32 %v1379_v39 }
 0x14b   : > { %v2894_v42 = vpop.eup %2893  ;;  %v1705_v27 = vmul.f32 %v1661_v61, %v3689_v37  ;;  %v1595_v6 = vadd.f32 2.0, %v1551_v63  ;;  %v1465_v8 = vmul.f32 %v2892_v20, %v2892_v20  ;;  %v1509_v43 = vmul.f32 2.0, %v2892_v20 }
 0x14c   : > { %v2896_v11 = vpop.eup %2895  ;;  %v1706_v13 = vmul.f32 %v1662_v2, %v3694_v58  ;;  %v1596_v14 = vadd.f32 2.0, %v1552_v3  ;;  %v1466_v29 = vmul.f32 %v2894_v42, %v2894_v42  ;;  %v1510_v10 = vmul.f32 2.0, %v2894_v42 }
 0x14d   : > { %v2898_v16 = vpop.eup %2897  ;;  %2905 = vtanh.f32 %v1705_v27  ;;  %v1663_v49 = vmul.f32 %v2896_v11, %v1531_v36  ;;  %v1553_v19 = vadd.f32 %v1509_v43, %v1465_v8  ;;  %v1421_v37 = vmul.f32 1.442695, %v1335_v4 }
 0x14e   : > { %v2900_v12 = vpop.eup %2899  ;;  %1814 = vst [vmem:[%s3569_s20 + $0x128] sm:$0xff] %v2898_v16  ;;  %2907 = vtanh.f32 %v1706_v13  ;;  %v1554_v53 = vadd.f32 %v1510_v10, %v1466_v29 }
 0x14f   : > { %v2902_v22 = vpop.eup %2901  ;;  %v1707_v59 = vmul.f32 %v1663_v49, %v3700_v38  ;;  %v1664_v54 = vmul.f32 %v2900_v12, %v1532_v45  ;;  %2909 = vrcp.f32 %v1595_v6  ;;  %v1597_v58 = vadd.f32 2.0, %v1553_v19 }
 0x150   : > { %v2904_v62 = vpop.eup %2903  ;;  %2911 = vrcp.f32 %v1596_v14  ;;  %v1598_v25 = vadd.f32 2.0, %v1554_v53  ;;  %v1445_v28 = vmul.f32 %v2902_v22, %v2902_v22  ;;  %v1489_v26 = vmul.f32 2.0, %v2902_v22 }
 0x151   : > { %2913 = vtanh.f32 %v1707_v59  ;;  %v1708_v24 = vmul.f32 %v1664_v54, %v3703_v15  ;;  %v1446_v33 = vmul.f32 %v2904_v62, %v2904_v62  ;;  %v1490_v32 = vmul.f32 2.0, %v2904_v62 }
 0x152   : > { %2915 = vrcp.f32 %v1597_v58  ;;  %v1533_v36 = vadd.f32 %v1489_v26, %v1445_v28  ;;  %v1423_v45 = vmul.f32 1.442695, %v1336_v21 }
 0x153   : > { %v2906_v40 = vpop.eup %2905  ;;  %2917 = vtanh.f32 %v1708_v24  ;;  %v1534_v38 = vadd.f32 %v1490_v32, %v1446_v33 }
 0x154   : > { %v2908_v41 = vpop.eup %2907  ;;  %1793 = vst [vmem:[%s3569_s20 + $0x80] sm:$0xff] %v2906_v40  ;;  %2919 = vrcp.f32 %v1598_v25  ;;  %v1577_v44 = vadd.f32 2.0, %v1533_v36 }
 0x155   : > { %v2910_v47 = vpop.eup %2909  ;;  %1794 = vst [vmem:[%s3569_s20 + $0x88] sm:$0xff] %v2908_v41  ;;  %v1578_v48 = vadd.f32 2.0, %v1534_v38  ;;  %2921 = vpow2.f32 %v1421_v37 }
 0x156   : > { %v2912_v17 = vpop.eup %2911  ;;  %v1683_v15 = vmul.f32 %v2910_v47, %v1551_v63  ;;  %2923 = vrcp.f32 %v1577_v44 }
 0x157   : > { %v2914_v50 = vpop.eup %2913  ;;  %v1684_v51 = vmul.f32 %v2912_v17, %v1552_v3  ;;  %2925 = vrcp.f32 %v1578_v48 }
 0x158   : > { %v2916_v35 = vpop.eup %2915  ;;  %1795 = vst [vmem:[%s3569_s20 + $0x90] sm:$0xff] %v2914_v50  ;;  %v1727_v34 = vmul.f32 %v1683_v15, %v3711_v30  ;;  %2927 = vpow2.f32 %v1423_v45 }
 0x159   : > { %v2918_v39 = vpop.eup %2917  ;;  %v1728_v55 = vmul.f32 %v1684_v51, %v3714_v46  ;;  %v1685_v5 = vmul.f32 %v2916_v35, %v1553_v19 }
 0x15a   : > { %v2920_v31 = vpop.eup %2919  ;;  %1796 = vst [vmem:[%s3569_s20 + $0x98] sm:$0xff] %v2918_v39  ;;  %2929 = vtanh.f32 %v1727_v34 }
 0x15b   : > { %v2922_v18 = vpop.eup %2921  ;;  %2931 = vtanh.f32 %v1728_v55  ;;  %v1729_v57 = vmul.f32 %v1685_v5, %v3722_v52  ;;  %v1686_v60 = vmul.f32 %v2920_v31, %v1554_v53 }
 0x15c   : > { %v2924_v1 = vpop.eup %2923  ;;  %v1467_v61 = vmul.f32 %v2922_v18, %v2922_v18  ;;  %v1511_v63 = vmul.f32 2.0, %v2922_v18 }
 0x15d   : > { %v2926_v20 = vpop.eup %2925  ;;  %2933 = vtanh.f32 %v1729_v57  ;;  %v1730_v30 = vmul.f32 %v1686_v60, %v3725_v56  ;;  %v1665_v2 = vmul.f32 %v2924_v1, %v1533_v36 }
 0x15e   : > { %v2928_v46 = vpop.eup %2927  ;;  %v1666_v3 = vmul.f32 %v2926_v20, %v1534_v38  ;;  %v1555_v4 = vadd.f32 %v1511_v63, %v1467_v61 }
 0x15f   : > { %2935 = vtanh.f32 %v1730_v30  ;;  %v1709_v42 = vmul.f32 %v1665_v2, %v3732_v7  ;;  %v1468_v27 = vmul.f32 %v2928_v46, %v2928_v46  ;;  %v1512_v52 = vmul.f32 2.0, %v2928_v46 }
 0x160   : > { %v2930_v6 = vpop.eup %2929  ;;  %v1710_v8 = vmul.f32 %v1666_v3, %v3738_v23  ;;  %v1599_v43 = vadd.f32 2.0, %v1555_v4 }
 0x161   : > { %v2932_v11 = vpop.eup %2931  ;;  %1815 = vst [vmem:[%s3569_s20 + $0x130] sm:$0xff] %v2930_v6  ;;  %2937 = vtanh.f32 %v1709_v42  ;;  %v1556_v56 = vadd.f32 %v1512_v52, %v1468_v27 }
 0x162   : > { %1816 = vst [vmem:[%s3569_s20 + $0x138] sm:$0xff] %v2932_v11  ;;  %2939 = vtanh.f32 %v1710_v8 }
 0x163   : > { %v2934_v13 = vpop.eup %2933  ;;  %2941 = vrcp.f32 %v1599_v43  ;;  %v1600_v14 = vadd.f32 2.0, %v1556_v56 }
 0x164   : > { %1817 = vst [vmem:[%s3569_s20 + $0x140] sm:$0xff] %v2934_v13 }
 0x165   : > { %v2936_v7 = vpop.eup %2935  ;;  %2943 = vrcp.f32 %v1600_v14 }
 0x166   : > { %1818 = vst [vmem:[%s3569_s20 + $0x148] sm:$0xff] %v2936_v7 }
 0x167   : > { %v2938_v29 = vpop.eup %2937 }
 0x168   : > { %v2940_v23 = vpop.eup %2939  ;;  %1797 = vst [vmem:[%s3569_s20 + $0xa0] sm:$0xff] %v2938_v29 }
 0x169   : > { %v2942_v10 = vpop.eup %2941  ;;  %1798 = vst [vmem:[%s3569_s20 + $0xa8] sm:$0xff] %v2940_v23 }
 0x16a   : > { %v1687_v16 = vmul.f32 %v2942_v10, %v1555_v4 }
 0x16b   : > { %v2944_v49 = vpop.eup %2943 }
 0x16c   : > { %v1731_v19 = vmul.f32 %v1687_v16, %v3746_v0  ;;  %v1688_v12 = vmul.f32 %v2944_v49, %v1556_v56 }
 0x16e   : > { %2945 = vtanh.f32 %v1731_v19  ;;  %v1732_v53 = vmul.f32 %v1688_v12, %v3750_v9 }
 0x170   : > { %2947 = vtanh.f32 %v1732_v53 }
 0x174   : > { %v2946_v37 = vpop.eup %2945 }
 0x175   : > { %1819 = vst [vmem:[%s3569_s20 + $0x150] sm:$0xff] %v2946_v37 }
 0x176   : > { %v2948_v21 = vpop.eup %2947 }
 0x177   : > { %1820 = vst [vmem:[%s3569_s20 + $0x158] sm:$0xff] %v2948_v21 }
 0x178   : > { %3036 = shalt.err (!%p3033_p10)
}
 0x179   : > { %s3086_s5 = smov 2816   ;;  %s3087_s6 = smov 176  }
 0x17a   : > { %2628 = dma.vmem_to_hbm [thread:$0]  (%p3170_p7), %s1835_s21, 5632, %s1837_s22, %s1822_s13, %s3086_s5, %s3086_s5, %s3087_s6  }
 0x17b PF: > { %s1851_s7 = sand.u32 1, %s3067_s9   ;;  %p3819_p12 = scmp.ge.s32.totalorder %s3079_s12, 2 }
 0x17c   : > { %s1852_s17 = scalar_lea.sflag [#allocation4], %s1851_s7 }
 0x17d   : > { %p2639_p13 = pnand %p3819_p12, %p3138_p6 }
 0x17f   : > { %p2640_p0 = pneg %p2639_p13 }
 0x181   : > { %3062 = dma.done.wait (%p2640_p0), %s1852_s17, 5632  }
 0x182   : > { %3064 = vsyncadd (%p2640_p0), %s1852_s17, 4294961664  ;;  %p16_p3 = scmp.ge.s32.totalorder %s3156_s23, 4   ;;  %s3820_s9 = smov %s3071_s10 }
 0x183   : > { %s3821_s10 = smov %s3075_s11  ;;  %s3822_s11 = smov %s3166_s28 }
 0x184   : > { %s3823_s12 = smov %s3156_s23  ;;  %18 = sbr.rel (!%p16_p3) target bundleno = 6 (0x6), region = 77 }
 0x189   :  { %1858 = vsyncpa [#allocation3], 1 }
 0x18a   :  { %1860 = vsyncpa [#allocation3 + $0x1], 1 }
 0x18b   :  { %1861 = vsyncpa [#allocation6], 1 }
 0x18c   :  { %1862 = vsyncpa [#allocation4], 1 }
 0x18d   :  { %1864 = vsyncpa [#allocation4 + $0x1], 1 }

</bundles_post_ra>
